<compile_context>
chip_gen: v7x
topology: tpu7x:2x2x1
jax: 0.10.0
libtpu: 0.0.40
codegen_flags: <defaults>
</compile_context>

<pallas_src>
import functools

import jax
import jax.numpy as jnp
from jax.experimental import pallas as pl
from jax.experimental.pallas import tpu as pltpu


def _round_up(x, m):
    return (x + m - 1) // m * m


# ----------------------------------------------------------------------------
# Capability check: single-buffering of grid-invariant blocks.
# ----------------------------------------------------------------------------
def _single_buffer_supported():
    if not hasattr(pl, "Buffered"):
        return False
    try:
        pl.BlockSpec((8, 128), lambda i: (0, 0), pipeline_mode=pl.Buffered(1))
        return True
    except Exception:  # pragma: no cover - older jax without pipeline_mode
        return False


_SINGLE_BUFFER = _single_buffer_supported()


def _resident_spec(shape):
    """BlockSpec for an input whose block is identical at every grid step."""
    ndim = len(shape)
    idx = lambda i: (0,) * ndim
    if _SINGLE_BUFFER:
        return pl.BlockSpec(shape, idx, pipeline_mode=pl.Buffered(1))
    return pl.BlockSpec(shape, idx)


# ----------------------------------------------------------------------------
# Weight / bias packing: PyTorch (4H, D) gate-stacked layout -> transposed,
# per-gate-padded (D_pad, 4*Hp) so in-kernel gate slices are 128-lane aligned.
# ----------------------------------------------------------------------------
def _pack_lstm_weight(w, hp, in_p):
    four_h, d = w.shape
    h = four_h // 4
    wp = jnp.zeros((4, hp, in_p), w.dtype)
    wp = wp.at[:, :h, :d].set(w.reshape(4, h, d))
    return wp.reshape(4 * hp, in_p).T                       # (in_p, 4*hp)


def _pack_lstm_bias(b_ih, b_hh, hp):
    h = b_ih.shape[0] // 4
    b = (b_ih + b_hh).reshape(4, h)
    bp = jnp.zeros((4, hp), b.dtype).at[:, :h].set(b)
    return bp.reshape(4 * hp)                               # (4*hp,)


# ----------------------------------------------------------------------------
# VMEM planning: pick time_block against a conservative budget and derive the
# vmem_limit_bytes to pass to Mosaic.  Budget fits v7x's 64 MiB/TC physical
# VMEM with headroom; the explicit limit also lifts v5e's 16 MiB default scope.
# ----------------------------------------------------------------------------
_VMEM_STREAM_BUDGET = 44 * 1024 * 1024


def _plan(T, Bp, Hp, gx_bytes, out_bytes, whh_bytes, requested_tb):
    resident_factor = 1 if _SINGLE_BUFFER else 2            # W_hh/h0/c0 buffers
    resident = (resident_factor * (Hp * 4 * Hp * whh_bytes + 2 * Bp * Hp * 4)
                + 2 * Bp * Hp * 4)                           # h/c scratch (f32)
    per_step = 2 * Bp * 4 * Hp * gx_bytes + 2 * Bp * Hp * out_bytes
    tb_fit = max(1, (_VMEM_STREAM_BUDGET - resident) // per_step)
    tb = int(max(1, min(requested_tb, T, tb_fit)))
    total = resident + tb * per_step
    vmem_limit = int(min(max(total * 5 // 4, 32 * 1024 * 1024),
                         60 * 1024 * 1024))
    return tb, vmem_limit


# ----------------------------------------------------------------------------
# Pallas kernel: the sequential part only.  One grid step == Tb time steps.
#   gx_ref : (Tb, Bp, 4Hp)  precomputed x@W_ih^T + bias for this time block
#   whh_ref: (Hp, 4Hp)      recurrent weight (resident, single-buffered)
#   out_ref: (Tb, Bp, Hp)   hidden states (local step order reversed if flip)
#   h_s,c_s: (Bp, Hp) f32   state, persists across grid steps
# ----------------------------------------------------------------------------
def _lstm_recurrence_kernel(gx_ref, whh_ref, h0_ref, c0_ref, out_ref,
                            h_s, c_s, *, hidden_p, t_block, flip):
    @pl.when(pl.program_id(0) == 0)
    def _():
        h_s[...] = h0_ref[...].astype(jnp.float32)
        c_s[...] = c0_ref[...].astype(jnp.float32)

    hp = hidden_p
    whh = whh_ref[...]                    # hoisted: one load per time block

    def sigmoid(v):                       # exact; keeps the divide off the VALU
        return 0.5 * jnp.tanh(0.5 * v) + 0.5

    def step(s, carry):
        h_prev, c_prev = carry
        # Single per-step MXU matmul (input projection hoisted, bias folded).
        gates = gx_ref[s].astype(jnp.float32) + jnp.dot(
            h_prev.astype(whh.dtype), whh,
            preferred_element_type=jnp.float32)
        # Gate boundaries are multiples of 128 lanes -> slices are free.
        i_g = sigmoid(gates[:, 0 * hp:1 * hp])
        f_g = sigmoid(gates[:, 1 * hp:2 * hp])
        g_g = jnp.tanh(gates[:, 2 * hp:3 * hp])
        o_g = sigmoid(gates[:, 3 * hp:4 * hp])
        c_t = f_g * c_prev + i_g * g_g
        h_t = o_g * jnp.tanh(c_t)
        dst = (t_block - 1 - s) if flip else s              # in-block flip
        out_ref[dst] = h_t.astype(out_ref.dtype)
        return (h_t, c_t)

    # Full unroll only for small H; partial unroll avoids vreg spills on the
    # critical recurrence chain when gate slabs get large.
    unroll = True if hp <= 256 else 2
    h_fin, c_fin = jax.lax.fori_loop(0, t_block, step, (h_s[...], c_s[...]),
                                     unroll=unroll)
    h_s[...] = h_fin
    c_s[...] = c_fin


def _lstm_recurrence(gx, whh, h0, c0, *, t_block, flip, out_dtype,
                     vmem_limit_bytes):
    """gx: (Tp, Bp, 4Hp) time-major; returns (Tp, Bp, Hp) (time-reversed in the
    padded time axis if flip)."""
    tp, bp, g = gx.shape
    hp = whh.shape[0]
    nblk = tp // t_block

    if flip:
        out_idx = lambda i: (nblk - 1 - i, 0, 0)            # cross-block flip
    else:
        out_idx = lambda i: (i, 0, 0)

    kernel = functools.partial(_lstm_recurrence_kernel,
                               hidden_p=hp, t_block=t_block, flip=flip)

    return pl.pallas_call(
        kernel,
        out_shape=jax.ShapeDtypeStruct((tp, bp, hp), out_dtype),
        grid_spec=pltpu.PrefetchScalarGridSpec(
            num_scalar_prefetch=0,
            grid=(nblk,),
            in_specs=[
                pl.BlockSpec((t_block, bp, g), lambda i: (i, 0, 0)),  # gates_x
                _resident_spec((hp, g)),             # W_hh^T (single-buffered)
                _resident_spec((bp, hp)),            # h0
                _resident_spec((bp, hp)),            # c0
            ],
            out_specs=pl.BlockSpec((t_block, bp, hp), out_idx),
            scratch_shapes=[
                pltpu.VMEM((bp, hp), jnp.float32),   # h state (persists)
                pltpu.VMEM((bp, hp), jnp.float32),   # c state (persists)
            ],
        ),
        compiler_params=pltpu.CompilerParams(
            dimension_semantics=("arbitrary",),      # sequential recurrence
            vmem_limit_bytes=vmem_limit_bytes),
    )(gx, whh, h0, c0)


# ----------------------------------------------------------------------------
# DecoderRNN: parameters + forward (matches PyTorch module semantics, eval).
# ----------------------------------------------------------------------------
def init_decoder_params(key, input_size, nhidden, nlayers):
    """uniform_(-0.1, 0.1) init, same shapes as nn.LSTM parameters."""
    params = []
    for layer in range(nlayers):
        d_in = input_size if layer == 0 else nhidden
        key, k1, k2, k3, k4 = jax.random.split(key, 5)
        params.append(dict(
            w_ih=jax.random.uniform(k1, (4 * nhidden, d_in), jnp.float32, -0.1, 0.1),
            w_hh=jax.random.uniform(k2, (4 * nhidden, nhidden), jnp.float32, -0.1, 0.1),
            b_ih=jax.random.uniform(k3, (4 * nhidden,), jnp.float32, -0.1, 0.1),
            b_hh=jax.random.uniform(k4, (4 * nhidden,), jnp.float32, -0.1, 0.1),
        ))
    return params


def decoder_rnn_forward(params, x, h, *, time_block=64, mxu_dtype=jnp.bfloat16):
    """Forward of DecoderRNN.

    x : (B, T, input_size)  batch_first, like the PyTorch module.
    h : tuple (h0, c0), each (nlayers, B, nhidden).
    returns torch.flip(lstm_output, [1])  -> (B, T, nhidden), float32.
    """
    h0_all, c0_all = h
    B, T, D = x.shape
    H = params[0]["w_hh"].shape[1]
    nlayers = len(params)

    mxu_dtype = jnp.dtype(mxu_dtype)
    sub = 16 if mxu_dtype.itemsize < 4 else 8   # packed sublanes for bf16 tiles
    Bp = _round_up(B, sub)
    Hp = _round_up(H, 128)                      # lane alignment (per gate)

    Tb, vmem_limit = _plan(T, Bp, Hp,
                           gx_bytes=mxu_dtype.itemsize,
                           out_bytes=4,                      # worst case (f32)
                           whh_bytes=mxu_dtype.itemsize,
                           requested_tb=time_block)
    Tp = _round_up(T, Tb)

    # Pad batch once (zero rows; discarded at the end).
    x_p = jnp.zeros((Bp, T, D), jnp.float32).at[:B].set(x.astype(jnp.float32))

    cur = None                      # time-major (Tp, Bp, Hp) after each layer
    for layer in range(nlayers):
        p = params[layer]
        d_in = D if layer == 0 else Hp
        wih_p = _pack_lstm_weight(p["w_ih"].astype(jnp.float32), Hp, d_in)
        whh_p = _pack_lstm_weight(p["w_hh"].astype(jnp.float32), Hp, Hp
                                  ).astype(mxu_dtype)
        bias_p = _pack_lstm_bias(p["b_ih"], p["b_hh"], Hp).astype(jnp.float32)

        # ---- Hoisted input projection: one big GEMM over all time steps. ----
        # (also produces the time-major layout directly, no separate transpose)
        if layer == 0:
            gx = jnp.einsum("btd,dg->tbg", x_p, wih_p,
                            preferred_element_type=jnp.float32) + bias_p
            if Tp != T:               # pad time (extra steps are discarded)
                gx = jnp.zeros((Tp, Bp, 4 * Hp), jnp.float32).at[:T].set(gx)
        else:
            gx = jnp.einsum("tbd,dg->tbg", cur, wih_p.astype(cur.dtype),
                            preferred_element_type=jnp.float32) + bias_p
        gx = gx.astype(mxu_dtype)     # stream gates_x at reduced width

        h0_p = jnp.zeros((Bp, Hp), jnp.float32).at[:B, :H].set(
            h0_all[layer].astype(jnp.float32))
        c0_p = jnp.zeros((Bp, Hp), jnp.float32).at[:B, :H].set(
            c0_all[layer].astype(jnp.float32))

        last = layer == nlayers - 1
        cur = _lstm_recurrence(
            gx, whh_p, h0_p, c0_p,
            t_block=Tb, flip=last,
            out_dtype=jnp.float32 if last else mxu_dtype,
            vmem_limit_bytes=vmem_limit)
        # TODO(synk): inter-layer dropout (train mode only) not applied.

    # cur is flipped in padded time; real flipped steps live at [Tp-T : Tp).
    # (trailing padded steps only contaminate the carried h/c state, which is
    #  never returned, so no masking is needed.)
    out_tm = cur[Tp - T:, :B, :H]                 # (T, B, H), already flipped
    return jnp.transpose(out_tm, (1, 0, 2))       # -> (B, T, H) batch_first


# ----------------------------------------------------------------------------
# Pure-JAX f32 reference (lax.scan LSTM) for correctness checks.
# ----------------------------------------------------------------------------
def _ref_forward(params, x, h):
    h0_all, c0_all = h
    cur = jnp.transpose(x, (1, 0, 2)).astype(jnp.float32)    # (T, B, D)
    H = params[0]["w_hh"].shape[1]
    for layer, p in enumerate(params):
        wih_t = p["w_ih"].T
        whh_t = p["w_hh"].T
        bias = p["b_ih"] + p["b_hh"]

        def step(carry, x_t):
            h_prev, c_prev = carry
            gates = x_t @ wih_t + h_prev @ whh_t + bias
            i_g = jax.nn.sigmoid(gates[:, 0 * H:1 * H])
            f_g = jax.nn.sigmoid(gates[:, 1 * H:2 * H])
            g_g = jnp.tanh(gates[:, 2 * H:3 * H])
            o_g = jax.nn.sigmoid(gates[:, 3 * H:4 * H])
            c_t = f_g * c_prev + i_g * g_g
            h_t = o_g * jnp.tanh(c_t)
            return (h_t, c_t), h_t

        (_, _), cur = jax.lax.scan(step, (h0_all[layer], c0_all[layer]), cur)
    out = jnp.transpose(cur, (1, 0, 2))                      # (B, T, H)
    return jnp.flip(out, axis=1)


if __name__ == "__main__":
    # Small shapes consistent with the module: LSTM(input_size, nhidden, nlayers)
    B, T = 2, 8
    input_size, nhidden, nlayers = 16, 32, 2

    key = jax.random.PRNGKey(0)
    kp, kx, kh, kc = jax.random.split(key, 4)

    params = init_decoder_params(kp, input_size, nhidden, nlayers)
    x = jax.random.normal(kx, (B, T, input_size), jnp.float32)
    h0 = jax.random.normal(kh, (nlayers, B, nhidden), jnp.float32)
    c0 = jax.random.normal(kc, (nlayers, B, nhidden), jnp.float32)

    fwd = jax.jit(decoder_rnn_forward,
                  static_argnames=("time_block", "mxu_dtype"))
    ref = jax.block_until_ready(_ref_forward(params, x, (h0, c0)))

    # Full-precision path; time_block=4 -> 2 time blocks (exercises the
    # cross-block flip index_map and the multi-step in-kernel loop).
    out_f32 = jax.block_until_ready(
        fwd(params, x, (h0, c0), time_block=4, mxu_dtype=jnp.float32))
    assert out_f32.shape == (B, T, nhidden)
    assert jnp.max(jnp.abs(out_f32 - ref)) < 1e-4

    # bf16 path (bf16 W_hh, bf16 streamed gates_x, bf16 inter-layer
    # activations, Bp padded to 16); time_block=5 -> padded time axis (Tp=10)
    # exercising the padded-flip slicing.
    out_bf16 = jax.block_until_ready(
        fwd(params, x, (h0, c0), time_block=5, mxu_dtype=jnp.bfloat16))
    assert out_bf16.shape == (B, T, nhidden)
    assert jnp.max(jnp.abs(out_bf16 - ref)) < 5e-2

    print("KERNEL_OK")
</pallas_src>

<mosaic_0001>
module attributes {stable_mosaic.version = 11 : i64} {
  func.func @_lstm_recurrence_kernel(%arg0: i32, %arg1: memref<4x8x512xf32, #tpu.memory_space<vmem>>, %arg2: memref<128x512xf32, #tpu.memory_space<vmem>>, %arg3: memref<8x128xf32, #tpu.memory_space<vmem>>, %arg4: memref<8x128xf32, #tpu.memory_space<vmem>>, %arg5: memref<4x8x128xf32, #tpu.memory_space<vmem>>, %arg6: memref<8x128xf32, #tpu.memory_space<vmem>>, %arg7: memref<8x128xf32, #tpu.memory_space<vmem>>) attributes {dimension_semantics = [#tpu.dimension_semantics<arbitrary>], iteration_bounds = array<i64: 2>, scalar_prefetch = 0 : i64, scratch_operands = 2 : i64, tpu.core_type = #tpu.core_type<tc>, window_params = [{transform_indices = @transform_0, window_bounds = array<i64: 4, 8, 512>}, {pipeline_mode = #tpu.pipeline_mode<synchronous>, transform_indices = @transform_1, window_bounds = array<i64: 128, 512>}, {pipeline_mode = #tpu.pipeline_mode<synchronous>, transform_indices = @transform_2, window_bounds = array<i64: 8, 128>}, {pipeline_mode = #tpu.pipeline_mode<synchronous>, transform_indices = @transform_3, window_bounds = array<i64: 8, 128>}, {transform_indices = @transform_4, window_bounds = array<i64: 4, 8, 128>}]} {
    %c0_i32 = arith.constant 0 : i32
    %0 = arith.cmpi eq, %arg0, %c0_i32 : i32
    %1 = arith.extui %0 : i1 to i32
    %c0_i32_0 = arith.constant 0 : i32
    %2 = arith.cmpi ne, %1, %c0_i32_0 : i32
    scf.if %2 {
      %c0_66 = arith.constant 0 : index
      %c0_67 = arith.constant 0 : index
      %168 = vector.load %arg3[%c0_66, %c0_67] : memref<8x128xf32, #tpu.memory_space<vmem>>, vector<8x128xf32>
      %c0_68 = arith.constant 0 : index
      %c0_69 = arith.constant 0 : index
      %169 = vector.load %arg6[%c0_68, %c0_69] : memref<8x128xf32, #tpu.memory_space<vmem>>, vector<8x128xf32>
      tpu.vector_store %arg6[%c0_68, %c0_69], %168 {strides = array<i32>} : memref<8x128xf32, #tpu.memory_space<vmem>>, vector<8x128xf32>,
      %c0_70 = arith.constant 0 : index
      %c0_71 = arith.constant 0 : index
      %170 = vector.load %arg4[%c0_70, %c0_71] : memref<8x128xf32, #tpu.memory_space<vmem>>, vector<8x128xf32>
      %c0_72 = arith.constant 0 : index
      %c0_73 = arith.constant 0 : index
      %171 = vector.load %arg7[%c0_72, %c0_73] : memref<8x128xf32, #tpu.memory_space<vmem>>, vector<8x128xf32>
      tpu.vector_store %arg7[%c0_72, %c0_73], %170 {strides = array<i32>} : memref<8x128xf32, #tpu.memory_space<vmem>>, vector<8x128xf32>,
    } else {
    }
    %c0 = arith.constant 0 : index
    %c0_1 = arith.constant 0 : index
    %3 = vector.load %arg2[%c0, %c0_1] : memref<128x512xf32, #tpu.memory_space<vmem>>, vector<128x512xf32>
    %c0_2 = arith.constant 0 : index
    %c0_3 = arith.constant 0 : index
    %4 = vector.load %arg6[%c0_2, %c0_3] : memref<8x128xf32, #tpu.memory_space<vmem>>, vector<8x128xf32>
    %c0_4 = arith.constant 0 : index
    %c0_5 = arith.constant 0 : index
    %5 = vector.load %arg7[%c0_4, %c0_5] : memref<8x128xf32, #tpu.memory_space<vmem>>, vector<8x128xf32>
    %c0_i32_6 = arith.constant 0 : i32
    %6 = arith.index_cast %c0_i32_6 : i32 to index
    %c0_7 = arith.constant 0 : index
    %c0_8 = arith.constant 0 : index
    %7 = vector.load %arg1[%6, %c0_7, %c0_8] : memref<4x8x512xf32, #tpu.memory_space<vmem>>, vector<1x8x512xf32>
    %8 = vector.shape_cast %7 : vector<1x8x512xf32> to vector<8x512xf32>
    %cst = arith.constant dense<0.000000e+00> : vector<8x512xf32>
    %9 = tpu.matmul %4, %3, %cst {dimension_numbers = #tpu.dot_dimension_numbers<[1], [0], [0], [1], [0, 0, 1, 1], [], []>} : vector<8x128xf32>, vector<128x512xf32>, vector<8x512xf32> -> vector<8x512xf32>
    %10 = arith.addf %8, %9 : vector<8x512xf32>
    %11 = vector.extract_strided_slice %10 {offsets = [0, 0], sizes = [8, 128], strides = [1, 1]} : vector<8x512xf32> to vector<8x128xf32>
    %cst_9 = arith.constant 5.000000e-01 : f32
    %12 = vector.broadcast %cst_9 : f32 to vector<8x128xf32>
    %13 = arith.mulf %12, %11 : vector<8x128xf32>
    %14 = math.tanh %13 : vector<8x128xf32>
    %cst_10 = arith.constant 5.000000e-01 : f32
    %15 = vector.broadcast %cst_10 : f32 to vector<8x128xf32>
    %16 = arith.mulf %15, %14 : vector<8x128xf32>
    %cst_11 = arith.constant 5.000000e-01 : f32
    %17 = vector.broadcast %cst_11 : f32 to vector<8x128xf32>
    %18 = arith.addf %16, %17 : vector<8x128xf32>
    %19 = vector.extract_strided_slice %10 {offsets = [0, 128], sizes = [8, 128], strides = [1, 1]} : vector<8x512xf32> to vector<8x128xf32>
    %cst_12 = arith.constant 5.000000e-01 : f32
    %20 = vector.broadcast %cst_12 : f32 to vector<8x128xf32>
    %21 = arith.mulf %20, %19 : vector<8x128xf32>
    %22 = math.tanh %21 : vector<8x128xf32>
    %cst_13 = arith.constant 5.000000e-01 : f32
    %23 = vector.broadcast %cst_13 : f32 to vector<8x128xf32>
    %24 = arith.mulf %23, %22 : vector<8x128xf32>
    %cst_14 = arith.constant 5.000000e-01 : f32
    %25 = vector.broadcast %cst_14 : f32 to vector<8x128xf32>
    %26 = arith.addf %24, %25 : vector<8x128xf32>
    %27 = vector.extract_strided_slice %10 {offsets = [0, 256], sizes = [8, 128], strides = [1, 1]} : vector<8x512xf32> to vector<8x128xf32>
    %28 = math.tanh %27 : vector<8x128xf32>
    %29 = vector.extract_strided_slice %10 {offsets = [0, 384], sizes = [8, 128], strides = [1, 1]} : vector<8x512xf32> to vector<8x128xf32>
    %cst_15 = arith.constant 5.000000e-01 : f32
    %30 = vector.broadcast %cst_15 : f32 to vector<8x128xf32>
    %31 = arith.mulf %30, %29 : vector<8x128xf32>
    %32 = math.tanh %31 : vector<8x128xf32>
    %cst_16 = arith.constant 5.000000e-01 : f32
    %33 = vector.broadcast %cst_16 : f32 to vector<8x128xf32>
    %34 = arith.mulf %33, %32 : vector<8x128xf32>
    %cst_17 = arith.constant 5.000000e-01 : f32
    %35 = vector.broadcast %cst_17 : f32 to vector<8x128xf32>
    %36 = arith.addf %34, %35 : vector<8x128xf32>
    %37 = arith.mulf %26, %5 : vector<8x128xf32>
    %38 = arith.mulf %18, %28 : vector<8x128xf32>
    %39 = arith.addf %37, %38 : vector<8x128xf32>
    %40 = math.tanh %39 : vector<8x128xf32>
    %41 = arith.mulf %36, %40 : vector<8x128xf32>
    %42 = arith.index_cast %c0_i32_6 : i32 to index
    %c0_18 = arith.constant 0 : index
    %c0_19 = arith.constant 0 : index
    %43 = vector.load %arg5[%42, %c0_18, %c0_19] : memref<4x8x128xf32, #tpu.memory_space<vmem>>, vector<1x8x128xf32>
    %44 = vector.shape_cast %43 : vector<1x8x128xf32> to vector<8x128xf32>
    %45 = vector.shape_cast %41 : vector<8x128xf32> to vector<1x8x128xf32>
    tpu.vector_store %arg5[%42, %c0_18, %c0_19], %45 {strides = array<i32>} : memref<4x8x128xf32, #tpu.memory_space<vmem>>, vector<1x8x128xf32>,
    %c1_i32 = arith.constant 1 : i32
    %46 = arith.index_cast %c1_i32 : i32 to index
    %c0_20 = arith.constant 0 : index
    %c0_21 = arith.constant 0 : index
    %47 = vector.load %arg1[%46, %c0_20, %c0_21] : memref<4x8x512xf32, #tpu.memory_space<vmem>>, vector<1x8x512xf32>
    %48 = vector.shape_cast %47 : vector<1x8x512xf32> to vector<8x512xf32>
    %cst_22 = arith.constant dense<0.000000e+00> : vector<8x512xf32>
    %49 = tpu.matmul %41, %3, %cst_22 {dimension_numbers = #tpu.dot_dimension_numbers<[1], [0], [0], [1], [0, 0, 1, 1], [], []>} : vector<8x128xf32>, vector<128x512xf32>, vector<8x512xf32> -> vector<8x512xf32>
    %50 = arith.addf %48, %49 : vector<8x512xf32>
    %51 = vector.extract_strided_slice %50 {offsets = [0, 0], sizes = [8, 128], strides = [1, 1]} : vector<8x512xf32> to vector<8x128xf32>
    %cst_23 = arith.constant 5.000000e-01 : f32
    %52 = vector.broadcast %cst_23 : f32 to vector<8x128xf32>
    %53 = arith.mulf %52, %51 : vector<8x128xf32>
    %54 = math.tanh %53 : vector<8x128xf32>
    %cst_24 = arith.constant 5.000000e-01 : f32
    %55 = vector.broadcast %cst_24 : f32 to vector<8x128xf32>
    %56 = arith.mulf %55, %54 : vector<8x128xf32>
    %cst_25 = arith.constant 5.000000e-01 : f32
    %57 = vector.broadcast %cst_25 : f32 to vector<8x128xf32>
    %58 = arith.addf %56, %57 : vector<8x128xf32>
    %59 = vector.extract_strided_slice %50 {offsets = [0, 128], sizes = [8, 128], strides = [1, 1]} : vector<8x512xf32> to vector<8x128xf32>
    %cst_26 = arith.constant 5.000000e-01 : f32
    %60 = vector.broadcast %cst_26 : f32 to vector<8x128xf32>
    %61 = arith.mulf %60, %59 : vector<8x128xf32>
    %62 = math.tanh %61 : vector<8x128xf32>
    %cst_27 = arith.constant 5.000000e-01 : f32
    %63 = vector.broadcast %cst_27 : f32 to vector<8x128xf32>
    %64 = arith.mulf %63, %62 : vector<8x128xf32>
    %cst_28 = arith.constant 5.000000e-01 : f32
    %65 = vector.broadcast %cst_28 : f32 to vector<8x128xf32>
    %66 = arith.addf %64, %65 : vector<8x128xf32>
    %67 = vector.extract_strided_slice %50 {offsets = [0, 256], sizes = [8, 128], strides = [1, 1]} : vector<8x512xf32> to vector<8x128xf32>
    %68 = math.tanh %67 : vector<8x128xf32>
    %69 = vector.extract_strided_slice %50 {offsets = [0, 384], sizes = [8, 128], strides = [1, 1]} : vector<8x512xf32> to vector<8x128xf32>
    %cst_29 = arith.constant 5.000000e-01 : f32
    %70 = vector.broadcast %cst_29 : f32 to vector<8x128xf32>
    %71 = arith.mulf %70, %69 : vector<8x128xf32>
    %72 = math.tanh %71 : vector<8x128xf32>
    %cst_30 = arith.constant 5.000000e-01 : f32
    %73 = vector.broadcast %cst_30 : f32 to vector<8x128xf32>
    %74 = arith.mulf %73, %72 : vector<8x128xf32>
    %cst_31 = arith.constant 5.000000e-01 : f32
    %75 = vector.broadcast %cst_31 : f32 to vector<8x128xf32>
    %76 = arith.addf %74, %75 : vector<8x128xf32>
    %77 = arith.mulf %66, %39 : vector<8x128xf32>
    %78 = arith.mulf %58, %68 : vector<8x128xf32>
    %79 = arith.addf %77, %78 : vector<8x128xf32>
    %80 = math.tanh %79 : vector<8x128xf32>
    %81 = arith.mulf %76, %80 : vector<8x128xf32>
    %82 = arith.index_cast %c1_i32 : i32 to index
    %c0_32 = arith.constant 0 : index
    %c0_33 = arith.constant 0 : index
    %83 = vector.load %arg5[%82, %c0_32, %c0_33] : memref<4x8x128xf32, #tpu.memory_space<vmem>>, vector<1x8x128xf32>
    %84 = vector.shape_cast %83 : vector<1x8x128xf32> to vector<8x128xf32>
    %85 = vector.shape_cast %81 : vector<8x128xf32> to vector<1x8x128xf32>
    tpu.vector_store %arg5[%82, %c0_32, %c0_33], %85 {strides = array<i32>} : memref<4x8x128xf32, #tpu.memory_space<vmem>>, vector<1x8x128xf32>,
    %c2_i32 = arith.constant 2 : i32
    %86 = arith.index_cast %c2_i32 : i32 to index
    %c0_34 = arith.constant 0 : index
    %c0_35 = arith.constant 0 : index
    %87 = vector.load %arg1[%86, %c0_34, %c0_35] : memref<4x8x512xf32, #tpu.memory_space<vmem>>, vector<1x8x512xf32>
    %88 = vector.shape_cast %87 : vector<1x8x512xf32> to vector<8x512xf32>
    %cst_36 = arith.constant dense<0.000000e+00> : vector<8x512xf32>
    %89 = tpu.matmul %81, %3, %cst_36 {dimension_numbers = #tpu.dot_dimension_numbers<[1], [0], [0], [1], [0, 0, 1, 1], [], []>} : vector<8x128xf32>, vector<128x512xf32>, vector<8x512xf32> -> vector<8x512xf32>
    %90 = arith.addf %88, %89 : vector<8x512xf32>
    %91 = vector.extract_strided_slice %90 {offsets = [0, 0], sizes = [8, 128], strides = [1, 1]} : vector<8x512xf32> to vector<8x128xf32>
    %cst_37 = arith.constant 5.000000e-01 : f32
    %92 = vector.broadcast %cst_37 : f32 to vector<8x128xf32>
    %93 = arith.mulf %92, %91 : vector<8x128xf32>
    %94 = math.tanh %93 : vector<8x128xf32>
    %cst_38 = arith.constant 5.000000e-01 : f32
    %95 = vector.broadcast %cst_38 : f32 to vector<8x128xf32>
    %96 = arith.mulf %95, %94 : vector<8x128xf32>
    %cst_39 = arith.constant 5.000000e-01 : f32
    %97 = vector.broadcast %cst_39 : f32 to vector<8x128xf32>
    %98 = arith.addf %96, %97 : vector<8x128xf32>
    %99 = vector.extract_strided_slice %90 {offsets = [0, 128], sizes = [8, 128], strides = [1, 1]} : vector<8x512xf32> to vector<8x128xf32>
    %cst_40 = arith.constant 5.000000e-01 : f32
    %100 = vector.broadcast %cst_40 : f32 to vector<8x128xf32>
    %101 = arith.mulf %100, %99 : vector<8x128xf32>
    %102 = math.tanh %101 : vector<8x128xf32>
    %cst_41 = arith.constant 5.000000e-01 : f32
    %103 = vector.broadcast %cst_41 : f32 to vector<8x128xf32>
    %104 = arith.mulf %103, %102 : vector<8x128xf32>
    %cst_42 = arith.constant 5.000000e-01 : f32
    %105 = vector.broadcast %cst_42 : f32 to vector<8x128xf32>
    %106 = arith.addf %104, %105 : vector<8x128xf32>
    %107 = vector.extract_strided_slice %90 {offsets = [0, 256], sizes = [8, 128], strides = [1, 1]} : vector<8x512xf32> to vector<8x128xf32>
    %108 = math.tanh %107 : vector<8x128xf32>
    %109 = vector.extract_strided_slice %90 {offsets = [0, 384], sizes = [8, 128], strides = [1, 1]} : vector<8x512xf32> to vector<8x128xf32>
    %cst_43 = arith.constant 5.000000e-01 : f32
    %110 = vector.broadcast %cst_43 : f32 to vector<8x128xf32>
    %111 = arith.mulf %110, %109 : vector<8x128xf32>
    %112 = math.tanh %111 : vector<8x128xf32>
    %cst_44 = arith.constant 5.000000e-01 : f32
    %113 = vector.broadcast %cst_44 : f32 to vector<8x128xf32>
    %114 = arith.mulf %113, %112 : vector<8x128xf32>
    %cst_45 = arith.constant 5.000000e-01 : f32
    %115 = vector.broadcast %cst_45 : f32 to vector<8x128xf32>
    %116 = arith.addf %114, %115 : vector<8x128xf32>
    %117 = arith.mulf %106, %79 : vector<8x128xf32>
    %118 = arith.mulf %98, %108 : vector<8x128xf32>
    %119 = arith.addf %117, %118 : vector<8x128xf32>
    %120 = math.tanh %119 : vector<8x128xf32>
    %121 = arith.mulf %116, %120 : vector<8x128xf32>
    %122 = arith.index_cast %c2_i32 : i32 to index
    %c0_46 = arith.constant 0 : index
    %c0_47 = arith.constant 0 : index
    %123 = vector.load %arg5[%122, %c0_46, %c0_47] : memref<4x8x128xf32, #tpu.memory_space<vmem>>, vector<1x8x128xf32>
    %124 = vector.shape_cast %123 : vector<1x8x128xf32> to vector<8x128xf32>
    %125 = vector.shape_cast %121 : vector<8x128xf32> to vector<1x8x128xf32>
    tpu.vector_store %arg5[%122, %c0_46, %c0_47], %125 {strides = array<i32>} : memref<4x8x128xf32, #tpu.memory_space<vmem>>, vector<1x8x128xf32>,
    %c3_i32 = arith.constant 3 : i32
    %126 = arith.index_cast %c3_i32 : i32 to index
    %c0_48 = arith.constant 0 : index
    %c0_49 = arith.constant 0 : index
    %127 = vector.load %arg1[%126, %c0_48, %c0_49] : memref<4x8x512xf32, #tpu.memory_space<vmem>>, vector<1x8x512xf32>
    %128 = vector.shape_cast %127 : vector<1x8x512xf32> to vector<8x512xf32>
    %cst_50 = arith.constant dense<0.000000e+00> : vector<8x512xf32>
    %129 = tpu.matmul %121, %3, %cst_50 {dimension_numbers = #tpu.dot_dimension_numbers<[1], [0], [0], [1], [0, 0, 1, 1], [], []>} : vector<8x128xf32>, vector<128x512xf32>, vector<8x512xf32> -> vector<8x512xf32>
    %130 = arith.addf %128, %129 : vector<8x512xf32>
    %131 = vector.extract_strided_slice %130 {offsets = [0, 0], sizes = [8, 128], strides = [1, 1]} : vector<8x512xf32> to vector<8x128xf32>
    %cst_51 = arith.constant 5.000000e-01 : f32
    %132 = vector.broadcast %cst_51 : f32 to vector<8x128xf32>
    %133 = arith.mulf %132, %131 : vector<8x128xf32>
    %134 = math.tanh %133 : vector<8x128xf32>
    %cst_52 = arith.constant 5.000000e-01 : f32
    %135 = vector.broadcast %cst_52 : f32 to vector<8x128xf32>
    %136 = arith.mulf %135, %134 : vector<8x128xf32>
    %cst_53 = arith.constant 5.000000e-01 : f32
    %137 = vector.broadcast %cst_53 : f32 to vector<8x128xf32>
    %138 = arith.addf %136, %137 : vector<8x128xf32>
    %139 = vector.extract_strided_slice %130 {offsets = [0, 128], sizes = [8, 128], strides = [1, 1]} : vector<8x512xf32> to vector<8x128xf32>
    %cst_54 = arith.constant 5.000000e-01 : f32
    %140 = vector.broadcast %cst_54 : f32 to vector<8x128xf32>
    %141 = arith.mulf %140, %139 : vector<8x128xf32>
    %142 = math.tanh %141 : vector<8x128xf32>
    %cst_55 = arith.constant 5.000000e-01 : f32
    %143 = vector.broadcast %cst_55 : f32 to vector<8x128xf32>
    %144 = arith.mulf %143, %142 : vector<8x128xf32>
    %cst_56 = arith.constant 5.000000e-01 : f32
    %145 = vector.broadcast %cst_56 : f32 to vector<8x128xf32>
    %146 = arith.addf %144, %145 : vector<8x128xf32>
    %147 = vector.extract_strided_slice %130 {offsets = [0, 256], sizes = [8, 128], strides = [1, 1]} : vector<8x512xf32> to vector<8x128xf32>
    %148 = math.tanh %147 : vector<8x128xf32>
    %149 = vector.extract_strided_slice %130 {offsets = [0, 384], sizes = [8, 128], strides = [1, 1]} : vector<8x512xf32> to vector<8x128xf32>
    %cst_57 = arith.constant 5.000000e-01 : f32
    %150 = vector.broadcast %cst_57 : f32 to vector<8x128xf32>
    %151 = arith.mulf %150, %149 : vector<8x128xf32>
    %152 = math.tanh %151 : vector<8x128xf32>
    %cst_58 = arith.constant 5.000000e-01 : f32
    %153 = vector.broadcast %cst_58 : f32 to vector<8x128xf32>
    %154 = arith.mulf %153, %152 : vector<8x128xf32>
    %cst_59 = arith.constant 5.000000e-01 : f32
    %155 = vector.broadcast %cst_59 : f32 to vector<8x128xf32>
    %156 = arith.addf %154, %155 : vector<8x128xf32>
    %157 = arith.mulf %146, %119 : vector<8x128xf32>
    %158 = arith.mulf %138, %148 : vector<8x128xf32>
    %159 = arith.addf %157, %158 : vector<8x128xf32>
    %160 = math.tanh %159 : vector<8x128xf32>
    %161 = arith.mulf %156, %160 : vector<8x128xf32>
    %162 = arith.index_cast %c3_i32 : i32 to index
    %c0_60 = arith.constant 0 : index
    %c0_61 = arith.constant 0 : index
    %163 = vector.load %arg5[%162, %c0_60, %c0_61] : memref<4x8x128xf32, #tpu.memory_space<vmem>>, vector<1x8x128xf32>
    %164 = vector.shape_cast %163 : vector<1x8x128xf32> to vector<8x128xf32>
    %165 = vector.shape_cast %161 : vector<8x128xf32> to vector<1x8x128xf32>
    tpu.vector_store %arg5[%162, %c0_60, %c0_61], %165 {strides = array<i32>} : memref<4x8x128xf32, #tpu.memory_space<vmem>>, vector<1x8x128xf32>,
    %c4_i32 = arith.constant 4 : i32
    %c0_62 = arith.constant 0 : index
    %c0_63 = arith.constant 0 : index
    %166 = vector.load %arg6[%c0_62, %c0_63] : memref<8x128xf32, #tpu.memory_space<vmem>>, vector<8x128xf32>
    tpu.vector_store %arg6[%c0_62, %c0_63], %161 {strides = array<i32>} : memref<8x128xf32, #tpu.memory_space<vmem>>, vector<8x128xf32>,
    %c0_64 = arith.constant 0 : index
    %c0_65 = arith.constant 0 : index
    %167 = vector.load %arg7[%c0_64, %c0_65] : memref<8x128xf32, #tpu.memory_space<vmem>>, vector<8x128xf32>
    tpu.vector_store %arg7[%c0_64, %c0_65], %159 {strides = array<i32>} : memref<8x128xf32, #tpu.memory_space<vmem>>, vector<8x128xf32>,
    return
  }
  func.func @transform_0(%arg0: i32) -> (i32, i32, i32) {
    %c0_i32 = arith.constant 0 : i32
    %c0_i32_0 = arith.constant 0 : i32
    %c0_i32_1 = arith.constant 0 : i32
    return %arg0, %c0_i32, %c0_i32_0 : i32, i32, i32
  }
  func.func @transform_1(%arg0: i32) -> (i32, i32) {
    %c0_i32 = arith.constant 0 : i32
    %c0_i32_0 = arith.constant 0 : i32
    %c0_i32_1 = arith.constant 0 : i32
    return %c0_i32, %c0_i32_0 : i32, i32
  }
  func.func @transform_2(%arg0: i32) -> (i32, i32) {
    %c0_i32 = arith.constant 0 : i32
    %c0_i32_0 = arith.constant 0 : i32
    %c0_i32_1 = arith.constant 0 : i32
    return %c0_i32, %c0_i32_0 : i32, i32
  }
  func.func @transform_3(%arg0: i32) -> (i32, i32) {
    %c0_i32 = arith.constant 0 : i32
    %c0_i32_0 = arith.constant 0 : i32
    %c0_i32_1 = arith.constant 0 : i32
    return %c0_i32, %c0_i32_0 : i32, i32
  }
  func.func @transform_4(%arg0: i32) -> (i32, i32, i32) {
    %c0_i32 = arith.constant 0 : i32
    %c0_i32_0 = arith.constant 0 : i32
    %c0_i32_1 = arith.constant 0 : i32
    return %arg0, %c0_i32, %c0_i32_0 : i32, i32, i32
  }
}

module attributes {stable_mosaic.version = 11 : i64} {
  func.func @_lstm_recurrence_kernel(%arg0: i32, %arg1: memref<4x8x512xf32, #tpu.memory_space<vmem>>, %arg2: memref<128x512xf32, #tpu.memory_space<vmem>>, %arg3: memref<8x128xf32, #tpu.memory_space<vmem>>, %arg4: memref<8x128xf32, #tpu.memory_space<vmem>>, %arg5: memref<4x8x128xf32, #tpu.memory_space<vmem>>, %arg6: memref<8x128xf32, #tpu.memory_space<vmem>>, %arg7: memref<8x128xf32, #tpu.memory_space<vmem>>) attributes {dimension_semantics = [#tpu.dimension_semantics<arbitrary>], iteration_bounds = array<i64: 2>, scalar_prefetch = 0 : i64, scratch_operands = 2 : i64, tpu.core_type = #tpu.core_type<tc>, window_params = [{transform_indices = @transform_0, window_bounds = array<i64: 4, 8, 512>}, {pipeline_mode = #tpu.pipeline_mode<synchronous>, transform_indices = @transform_1, window_bounds = array<i64: 128, 512>}, {pipeline_mode = #tpu.pipeline_mode<synchronous>, transform_indices = @transform_2, window_bounds = array<i64: 8, 128>}, {pipeline_mode = #tpu.pipeline_mode<synchronous>, transform_indices = @transform_3, window_bounds = array<i64: 8, 128>}, {transform_indices = @transform_4, window_bounds = array<i64: 4, 8, 128>}]} {
    %c0_i32 = arith.constant 0 : i32
    %0 = arith.cmpi eq, %arg0, %c0_i32 : i32
    %1 = arith.extui %0 : i1 to i32
    %c0_i32_0 = arith.constant 0 : i32
    %2 = arith.cmpi ne, %1, %c0_i32_0 : i32
    scf.if %2 {
      %c0_70 = arith.constant 0 : index
      %c0_71 = arith.constant 0 : index
      %172 = vector.load %arg3[%c0_70, %c0_71] : memref<8x128xf32, #tpu.memory_space<vmem>>, vector<8x128xf32>
      %c0_72 = arith.constant 0 : index
      %c0_73 = arith.constant 0 : index
      %173 = vector.load %arg6[%c0_72, %c0_73] : memref<8x128xf32, #tpu.memory_space<vmem>>, vector<8x128xf32>
      tpu.vector_store %arg6[%c0_72, %c0_73], %172 {strides = array<i32>} : memref<8x128xf32, #tpu.memory_space<vmem>>, vector<8x128xf32>,
      %c0_74 = arith.constant 0 : index
      %c0_75 = arith.constant 0 : index
      %174 = vector.load %arg4[%c0_74, %c0_75] : memref<8x128xf32, #tpu.memory_space<vmem>>, vector<8x128xf32>
      %c0_76 = arith.constant 0 : index
      %c0_77 = arith.constant 0 : index
      %175 = vector.load %arg7[%c0_76, %c0_77] : memref<8x128xf32, #tpu.memory_space<vmem>>, vector<8x128xf32>
      tpu.vector_store %arg7[%c0_76, %c0_77], %174 {strides = array<i32>} : memref<8x128xf32, #tpu.memory_space<vmem>>, vector<8x128xf32>,
    } else {
    }
    %c0 = arith.constant 0 : index
    %c0_1 = arith.constant 0 : index
    %3 = vector.load %arg2[%c0, %c0_1] : memref<128x512xf32, #tpu.memory_space<vmem>>, vector<128x512xf32>
    %c0_2 = arith.constant 0 : index
    %c0_3 = arith.constant 0 : index
    %4 = vector.load %arg6[%c0_2, %c0_3] : memref<8x128xf32, #tpu.memory_space<vmem>>, vector<8x128xf32>
    %c0_4 = arith.constant 0 : index
    %c0_5 = arith.constant 0 : index
    %5 = vector.load %arg7[%c0_4, %c0_5] : memref<8x128xf32, #tpu.memory_space<vmem>>, vector<8x128xf32>
    %c0_i32_6 = arith.constant 0 : i32
    %6 = arith.index_cast %c0_i32_6 : i32 to index
    %c0_7 = arith.constant 0 : index
    %c0_8 = arith.constant 0 : index
    %7 = vector.load %arg1[%6, %c0_7, %c0_8] : memref<4x8x512xf32, #tpu.memory_space<vmem>>, vector<1x8x512xf32>
    %8 = vector.shape_cast %7 : vector<1x8x512xf32> to vector<8x512xf32>
    %cst = arith.constant dense<0.000000e+00> : vector<8x512xf32>
    %9 = tpu.matmul %4, %3, %cst {dimension_numbers = #tpu.dot_dimension_numbers<[1], [0], [0], [1], [0, 0, 1, 1], [], []>} : vector<8x128xf32>, vector<128x512xf32>, vector<8x512xf32> -> vector<8x512xf32>
    %10 = arith.addf %8, %9 : vector<8x512xf32>
    %11 = vector.extract_strided_slice %10 {offsets = [0, 0], sizes = [8, 128], strides = [1, 1]} : vector<8x512xf32> to vector<8x128xf32>
    %cst_9 = arith.constant 5.000000e-01 : f32
    %12 = vector.broadcast %cst_9 : f32 to vector<8x128xf32>
    %13 = arith.mulf %12, %11 : vector<8x128xf32>
    %14 = math.tanh %13 : vector<8x128xf32>
    %cst_10 = arith.constant 5.000000e-01 : f32
    %15 = vector.broadcast %cst_10 : f32 to vector<8x128xf32>
    %16 = arith.mulf %15, %14 : vector<8x128xf32>
    %cst_11 = arith.constant 5.000000e-01 : f32
    %17 = vector.broadcast %cst_11 : f32 to vector<8x128xf32>
    %18 = arith.addf %16, %17 : vector<8x128xf32>
    %19 = vector.extract_strided_slice %10 {offsets = [0, 128], sizes = [8, 128], strides = [1, 1]} : vector<8x512xf32> to vector<8x128xf32>
    %cst_12 = arith.constant 5.000000e-01 : f32
    %20 = vector.broadcast %cst_12 : f32 to vector<8x128xf32>
    %21 = arith.mulf %20, %19 : vector<8x128xf32>
    %22 = math.tanh %21 : vector<8x128xf32>
    %cst_13 = arith.constant 5.000000e-01 : f32
    %23 = vector.broadcast %cst_13 : f32 to vector<8x128xf32>
    %24 = arith.mulf %23, %22 : vector<8x128xf32>
    %cst_14 = arith.constant 5.000000e-01 : f32
    %25 = vector.broadcast %cst_14 : f32 to vector<8x128xf32>
    %26 = arith.addf %24, %25 : vector<8x128xf32>
    %27 = vector.extract_strided_slice %10 {offsets = [0, 256], sizes = [8, 128], strides = [1, 1]} : vector<8x512xf32> to vector<8x128xf32>
    %28 = math.tanh %27 : vector<8x128xf32>
    %29 = vector.extract_strided_slice %10 {offsets = [0, 384], sizes = [8, 128], strides = [1, 1]} : vector<8x512xf32> to vector<8x128xf32>
    %cst_15 = arith.constant 5.000000e-01 : f32
    %30 = vector.broadcast %cst_15 : f32 to vector<8x128xf32>
    %31 = arith.mulf %30, %29 : vector<8x128xf32>
    %32 = math.tanh %31 : vector<8x128xf32>
    %cst_16 = arith.constant 5.000000e-01 : f32
    %33 = vector.broadcast %cst_16 : f32 to vector<8x128xf32>
    %34 = arith.mulf %33, %32 : vector<8x128xf32>
    %cst_17 = arith.constant 5.000000e-01 : f32
    %35 = vector.broadcast %cst_17 : f32 to vector<8x128xf32>
    %36 = arith.addf %34, %35 : vector<8x128xf32>
    %37 = arith.mulf %26, %5 : vector<8x128xf32>
    %38 = arith.mulf %18, %28 : vector<8x128xf32>
    %39 = arith.addf %37, %38 : vector<8x128xf32>
    %40 = math.tanh %39 : vector<8x128xf32>
    %41 = arith.mulf %36, %40 : vector<8x128xf32>
    %c3_i32 = arith.constant 3 : i32
    %42 = arith.subi %c3_i32, %c0_i32_6 : i32
    %43 = arith.index_cast %42 : i32 to index
    %c0_18 = arith.constant 0 : index
    %c0_19 = arith.constant 0 : index
    %44 = vector.load %arg5[%43, %c0_18, %c0_19] : memref<4x8x128xf32, #tpu.memory_space<vmem>>, vector<1x8x128xf32>
    %45 = vector.shape_cast %44 : vector<1x8x128xf32> to vector<8x128xf32>
    %46 = vector.shape_cast %41 : vector<8x128xf32> to vector<1x8x128xf32>
    tpu.vector_store %arg5[%43, %c0_18, %c0_19], %46 {strides = array<i32>} : memref<4x8x128xf32, #tpu.memory_space<vmem>>, vector<1x8x128xf32>,
    %c1_i32 = arith.constant 1 : i32
    %47 = arith.index_cast %c1_i32 : i32 to index
    %c0_20 = arith.constant 0 : index
    %c0_21 = arith.constant 0 : index
    %48 = vector.load %arg1[%47, %c0_20, %c0_21] : memref<4x8x512xf32, #tpu.memory_space<vmem>>, vector<1x8x512xf32>
    %49 = vector.shape_cast %48 : vector<1x8x512xf32> to vector<8x512xf32>
    %cst_22 = arith.constant dense<0.000000e+00> : vector<8x512xf32>
    %50 = tpu.matmul %41, %3, %cst_22 {dimension_numbers = #tpu.dot_dimension_numbers<[1], [0], [0], [1], [0, 0, 1, 1], [], []>} : vector<8x128xf32>, vector<128x512xf32>, vector<8x512xf32> -> vector<8x512xf32>
    %51 = arith.addf %49, %50 : vector<8x512xf32>
    %52 = vector.extract_strided_slice %51 {offsets = [0, 0], sizes = [8, 128], strides = [1, 1]} : vector<8x512xf32> to vector<8x128xf32>
    %cst_23 = arith.constant 5.000000e-01 : f32
    %53 = vector.broadcast %cst_23 : f32 to vector<8x128xf32>
    %54 = arith.mulf %53, %52 : vector<8x128xf32>
    %55 = math.tanh %54 : vector<8x128xf32>
    %cst_24 = arith.constant 5.000000e-01 : f32
    %56 = vector.broadcast %cst_24 : f32 to vector<8x128xf32>
    %57 = arith.mulf %56, %55 : vector<8x128xf32>
    %cst_25 = arith.constant 5.000000e-01 : f32
    %58 = vector.broadcast %cst_25 : f32 to vector<8x128xf32>
    %59 = arith.addf %57, %58 : vector<8x128xf32>
    %60 = vector.extract_strided_slice %51 {offsets = [0, 128], sizes = [8, 128], strides = [1, 1]} : vector<8x512xf32> to vector<8x128xf32>
    %cst_26 = arith.constant 5.000000e-01 : f32
    %61 = vector.broadcast %cst_26 : f32 to vector<8x128xf32>
    %62 = arith.mulf %61, %60 : vector<8x128xf32>
    %63 = math.tanh %62 : vector<8x128xf32>
    %cst_27 = arith.constant 5.000000e-01 : f32
    %64 = vector.broadcast %cst_27 : f32 to vector<8x128xf32>
    %65 = arith.mulf %64, %63 : vector<8x128xf32>
    %cst_28 = arith.constant 5.000000e-01 : f32
    %66 = vector.broadcast %cst_28 : f32 to vector<8x128xf32>
    %67 = arith.addf %65, %66 : vector<8x128xf32>
    %68 = vector.extract_strided_slice %51 {offsets = [0, 256], sizes = [8, 128], strides = [1, 1]} : vector<8x512xf32> to vector<8x128xf32>
    %69 = math.tanh %68 : vector<8x128xf32>
    %70 = vector.extract_strided_slice %51 {offsets = [0, 384], sizes = [8, 128], strides = [1, 1]} : vector<8x512xf32> to vector<8x128xf32>
    %cst_29 = arith.constant 5.000000e-01 : f32
    %71 = vector.broadcast %cst_29 : f32 to vector<8x128xf32>
    %72 = arith.mulf %71, %70 : vector<8x128xf32>
    %73 = math.tanh %72 : vector<8x128xf32>
    %cst_30 = arith.constant 5.000000e-01 : f32
    %74 = vector.broadcast %cst_30 : f32 to vector<8x128xf32>
    %75 = arith.mulf %74, %73 : vector<8x128xf32>
    %cst_31 = arith.constant 5.000000e-01 : f32
    %76 = vector.broadcast %cst_31 : f32 to vector<8x128xf32>
    %77 = arith.addf %75, %76 : vector<8x128xf32>
    %78 = arith.mulf %67, %39 : vector<8x128xf32>
    %79 = arith.mulf %59, %69 : vector<8x128xf32>
    %80 = arith.addf %78, %79 : vector<8x128xf32>
    %81 = math.tanh %80 : vector<8x128xf32>
    %82 = arith.mulf %77, %81 : vector<8x128xf32>
    %c3_i32_32 = arith.constant 3 : i32
    %83 = arith.subi %c3_i32_32, %c1_i32 : i32
    %84 = arith.index_cast %83 : i32 to index
    %c0_33 = arith.constant 0 : index
    %c0_34 = arith.constant 0 : index
    %85 = vector.load %arg5[%84, %c0_33, %c0_34] : memref<4x8x128xf32, #tpu.memory_space<vmem>>, vector<1x8x128xf32>
    %86 = vector.shape_cast %85 : vector<1x8x128xf32> to vector<8x128xf32>
    %87 = vector.shape_cast %82 : vector<8x128xf32> to vector<1x8x128xf32>
    tpu.vector_store %arg5[%84, %c0_33, %c0_34], %87 {strides = array<i32>} : memref<4x8x128xf32, #tpu.memory_space<vmem>>, vector<1x8x128xf32>,
    %c2_i32 = arith.constant 2 : i32
    %88 = arith.index_cast %c2_i32 : i32 to index
    %c0_35 = arith.constant 0 : index
    %c0_36 = arith.constant 0 : index
    %89 = vector.load %arg1[%88, %c0_35, %c0_36] : memref<4x8x512xf32, #tpu.memory_space<vmem>>, vector<1x8x512xf32>
    %90 = vector.shape_cast %89 : vector<1x8x512xf32> to vector<8x512xf32>
    %cst_37 = arith.constant dense<0.000000e+00> : vector<8x512xf32>
    %91 = tpu.matmul %82, %3, %cst_37 {dimension_numbers = #tpu.dot_dimension_numbers<[1], [0], [0], [1], [0, 0, 1, 1], [], []>} : vector<8x128xf32>, vector<128x512xf32>, vector<8x512xf32> -> vector<8x512xf32>
    %92 = arith.addf %90, %91 : vector<8x512xf32>
    %93 = vector.extract_strided_slice %92 {offsets = [0, 0], sizes = [8, 128], strides = [1, 1]} : vector<8x512xf32> to vector<8x128xf32>
    %cst_38 = arith.constant 5.000000e-01 : f32
    %94 = vector.broadcast %cst_38 : f32 to vector<8x128xf32>
    %95 = arith.mulf %94, %93 : vector<8x128xf32>
    %96 = math.tanh %95 : vector<8x128xf32>
    %cst_39 = arith.constant 5.000000e-01 : f32
    %97 = vector.broadcast %cst_39 : f32 to vector<8x128xf32>
    %98 = arith.mulf %97, %96 : vector<8x128xf32>
    %cst_40 = arith.constant 5.000000e-01 : f32
    %99 = vector.broadcast %cst_40 : f32 to vector<8x128xf32>
    %100 = arith.addf %98, %99 : vector<8x128xf32>
    %101 = vector.extract_strided_slice %92 {offsets = [0, 128], sizes = [8, 128], strides = [1, 1]} : vector<8x512xf32> to vector<8x128xf32>
    %cst_41 = arith.constant 5.000000e-01 : f32
    %102 = vector.broadcast %cst_41 : f32 to vector<8x128xf32>
    %103 = arith.mulf %102, %101 : vector<8x128xf32>
    %104 = math.tanh %103 : vector<8x128xf32>
    %cst_42 = arith.constant 5.000000e-01 : f32
    %105 = vector.broadcast %cst_42 : f32 to vector<8x128xf32>
    %106 = arith.mulf %105, %104 : vector<8x128xf32>
    %cst_43 = arith.constant 5.000000e-01 : f32
    %107 = vector.broadcast %cst_43 : f32 to vector<8x128xf32>
    %108 = arith.addf %106, %107 : vector<8x128xf32>
    %109 = vector.extract_strided_slice %92 {offsets = [0, 256], sizes = [8, 128], strides = [1, 1]} : vector<8x512xf32> to vector<8x128xf32>
    %110 = math.tanh %109 : vector<8x128xf32>
    %111 = vector.extract_strided_slice %92 {offsets = [0, 384], sizes = [8, 128], strides = [1, 1]} : vector<8x512xf32> to vector<8x128xf32>
    %cst_44 = arith.constant 5.000000e-01 : f32
    %112 = vector.broadcast %cst_44 : f32 to vector<8x128xf32>
    %113 = arith.mulf %112, %111 : vector<8x128xf32>
    %114 = math.tanh %113 : vector<8x128xf32>
    %cst_45 = arith.constant 5.000000e-01 : f32
    %115 = vector.broadcast %cst_45 : f32 to vector<8x128xf32>
    %116 = arith.mulf %115, %114 : vector<8x128xf32>
    %cst_46 = arith.constant 5.000000e-01 : f32
    %117 = vector.broadcast %cst_46 : f32 to vector<8x128xf32>
    %118 = arith.addf %116, %117 : vector<8x128xf32>
    %119 = arith.mulf %108, %80 : vector<8x128xf32>
    %120 = arith.mulf %100, %110 : vector<8x128xf32>
    %121 = arith.addf %119, %120 : vector<8x128xf32>
    %122 = math.tanh %121 : vector<8x128xf32>
    %123 = arith.mulf %118, %122 : vector<8x128xf32>
    %c3_i32_47 = arith.constant 3 : i32
    %124 = arith.subi %c3_i32_47, %c2_i32 : i32
    %125 = arith.index_cast %124 : i32 to index
    %c0_48 = arith.constant 0 : index
    %c0_49 = arith.constant 0 : index
    %126 = vector.load %arg5[%125, %c0_48, %c0_49] : memref<4x8x128xf32, #tpu.memory_space<vmem>>, vector<1x8x128xf32>
    %127 = vector.shape_cast %126 : vector<1x8x128xf32> to vector<8x128xf32>
    %128 = vector.shape_cast %123 : vector<8x128xf32> to vector<1x8x128xf32>
    tpu.vector_store %arg5[%125, %c0_48, %c0_49], %128 {strides = array<i32>} : memref<4x8x128xf32, #tpu.memory_space<vmem>>, vector<1x8x128xf32>,
    %c3_i32_50 = arith.constant 3 : i32
    %129 = arith.index_cast %c3_i32_50 : i32 to index
    %c0_51 = arith.constant 0 : index
    %c0_52 = arith.constant 0 : index
    %130 = vector.load %arg1[%129, %c0_51, %c0_52] : memref<4x8x512xf32, #tpu.memory_space<vmem>>, vector<1x8x512xf32>
    %131 = vector.shape_cast %130 : vector<1x8x512xf32> to vector<8x512xf32>
    %cst_53 = arith.constant dense<0.000000e+00> : vector<8x512xf32>
    %132 = tpu.matmul %123, %3, %cst_53 {dimension_numbers = #tpu.dot_dimension_numbers<[1], [0], [0], [1], [0, 0, 1, 1], [], []>} : vector<8x128xf32>, vector<128x512xf32>, vector<8x512xf32> -> vector<8x512xf32>
    %133 = arith.addf %131, %132 : vector<8x512xf32>
    %134 = vector.extract_strided_slice %133 {offsets = [0, 0], sizes = [8, 128], strides = [1, 1]} : vector<8x512xf32> to vector<8x128xf32>
    %cst_54 = arith.constant 5.000000e-01 : f32
    %135 = vector.broadcast %cst_54 : f32 to vector<8x128xf32>
    %136 = arith.mulf %135, %134 : vector<8x128xf32>
    %137 = math.tanh %136 : vector<8x128xf32>
    %cst_55 = arith.constant 5.000000e-01 : f32
    %138 = vector.broadcast %cst_55 : f32 to vector<8x128xf32>
    %139 = arith.mulf %138, %137 : vector<8x128xf32>
    %cst_56 = arith.constant 5.000000e-01 : f32
    %140 = vector.broadcast %cst_56 : f32 to vector<8x128xf32>
    %141 = arith.addf %139, %140 : vector<8x128xf32>
    %142 = vector.extract_strided_slice %133 {offsets = [0, 128], sizes = [8, 128], strides = [1, 1]} : vector<8x512xf32> to vector<8x128xf32>
    %cst_57 = arith.constant 5.000000e-01 : f32
    %143 = vector.broadcast %cst_57 : f32 to vector<8x128xf32>
    %144 = arith.mulf %143, %142 : vector<8x128xf32>
    %145 = math.tanh %144 : vector<8x128xf32>
    %cst_58 = arith.constant 5.000000e-01 : f32
    %146 = vector.broadcast %cst_58 : f32 to vector<8x128xf32>
    %147 = arith.mulf %146, %145 : vector<8x128xf32>
    %cst_59 = arith.constant 5.000000e-01 : f32
    %148 = vector.broadcast %cst_59 : f32 to vector<8x128xf32>
    %149 = arith.addf %147, %148 : vector<8x128xf32>
    %150 = vector.extract_strided_slice %133 {offsets = [0, 256], sizes = [8, 128], strides = [1, 1]} : vector<8x512xf32> to vector<8x128xf32>
    %151 = math.tanh %150 : vector<8x128xf32>
    %152 = vector.extract_strided_slice %133 {offsets = [0, 384], sizes = [8, 128], strides = [1, 1]} : vector<8x512xf32> to vector<8x128xf32>
    %cst_60 = arith.constant 5.000000e-01 : f32
    %153 = vector.broadcast %cst_60 : f32 to vector<8x128xf32>
    %154 = arith.mulf %153, %152 : vector<8x128xf32>
    %155 = math.tanh %154 : vector<8x128xf32>
    %cst_61 = arith.constant 5.000000e-01 : f32
    %156 = vector.broadcast %cst_61 : f32 to vector<8x128xf32>
    %157 = arith.mulf %156, %155 : vector<8x128xf32>
    %cst_62 = arith.constant 5.000000e-01 : f32
    %158 = vector.broadcast %cst_62 : f32 to vector<8x128xf32>
    %159 = arith.addf %157, %158 : vector<8x128xf32>
    %160 = arith.mulf %149, %121 : vector<8x128xf32>
    %161 = arith.mulf %141, %151 : vector<8x128xf32>
    %162 = arith.addf %160, %161 : vector<8x128xf32>
    %163 = math.tanh %162 : vector<8x128xf32>
    %164 = arith.mulf %159, %163 : vector<8x128xf32>
    %c3_i32_63 = arith.constant 3 : i32
    %165 = arith.subi %c3_i32_63, %c3_i32_50 : i32
    %166 = arith.index_cast %165 : i32 to index
    %c0_64 = arith.constant 0 : index
    %c0_65 = arith.constant 0 : index
    %167 = vector.load %arg5[%166, %c0_64, %c0_65] : memref<4x8x128xf32, #tpu.memory_space<vmem>>, vector<1x8x128xf32>
    %168 = vector.shape_cast %167 : vector<1x8x128xf32> to vector<8x128xf32>
    %169 = vector.shape_cast %164 : vector<8x128xf32> to vector<1x8x128xf32>
    tpu.vector_store %arg5[%166, %c0_64, %c0_65], %169 {strides = array<i32>} : memref<4x8x128xf32, #tpu.memory_space<vmem>>, vector<1x8x128xf32>,
    %c4_i32 = arith.constant 4 : i32
    %c0_66 = arith.constant 0 : index
    %c0_67 = arith.constant 0 : index
    %170 = vector.load %arg6[%c0_66, %c0_67] : memref<8x128xf32, #tpu.memory_space<vmem>>, vector<8x128xf32>
    tpu.vector_store %arg6[%c0_66, %c0_67], %164 {strides = array<i32>} : memref<8x128xf32, #tpu.memory_space<vmem>>, vector<8x128xf32>,
    %c0_68 = arith.constant 0 : index
    %c0_69 = arith.constant 0 : index
    %171 = vector.load %arg7[%c0_68, %c0_69] : memref<8x128xf32, #tpu.memory_space<vmem>>, vector<8x128xf32>
    tpu.vector_store %arg7[%c0_68, %c0_69], %162 {strides = array<i32>} : memref<8x128xf32, #tpu.memory_space<vmem>>, vector<8x128xf32>,
    return
  }
  func.func @transform_0(%arg0: i32) -> (i32, i32, i32) {
    %c0_i32 = arith.constant 0 : i32
    %c0_i32_0 = arith.constant 0 : i32
    %c0_i32_1 = arith.constant 0 : i32
    return %arg0, %c0_i32, %c0_i32_0 : i32, i32, i32
  }
  func.func @transform_1(%arg0: i32) -> (i32, i32) {
    %c0_i32 = arith.constant 0 : i32
    %c0_i32_0 = arith.constant 0 : i32
    %c0_i32_1 = arith.constant 0 : i32
    return %c0_i32, %c0_i32_0 : i32, i32
  }
  func.func @transform_2(%arg0: i32) -> (i32, i32) {
    %c0_i32 = arith.constant 0 : i32
    %c0_i32_0 = arith.constant 0 : i32
    %c0_i32_1 = arith.constant 0 : i32
    return %c0_i32, %c0_i32_0 : i32, i32
  }
  func.func @transform_3(%arg0: i32) -> (i32, i32) {
    %c0_i32 = arith.constant 0 : i32
    %c0_i32_0 = arith.constant 0 : i32
    %c0_i32_1 = arith.constant 0 : i32
    return %c0_i32, %c0_i32_0 : i32, i32
  }
  func.func @transform_4(%arg0: i32) -> (i32, i32, i32) {
    %c1_i32 = arith.constant 1 : i32
    %0 = arith.subi %c1_i32, %arg0 : i32
    %c0_i32 = arith.constant 0 : i32
    %c0_i32_0 = arith.constant 0 : i32
    %c0_i32_1 = arith.constant 0 : i32
    return %0, %c0_i32, %c0_i32_0 : i32, i32, i32
  }
}

</mosaic_0001>

<bundles_post_ra>
// kernel: decoder_rnn_forward.3
= control target key start
LH: loop header
LB: loop body
LE: loop exit
PB: predicated region body
PF: predicated region fallthrough
CT: control target
= control target key end

     0   :  { %s1394_s15 = smov 0   ;;  %s1841_s0 = inlined_call_operand.vmem [shape: f32[8,8,512], index: 0, kind: input, shape index: {}]   ;;  %s1842_s1 = inlined_call_operand.vmem [shape: f32[128,512], index: 1, kind: input, shape index: {}]   ;;  %s1843_s2 = inlined_call_operand.vmem [shape: f32[8,128], index: 2, kind: input, shape index: {}]   ;;  %s1844_s3 = inlined_call_operand.vmem [shape: f32[8,128], index: 3, kind: input, shape index: {}]   ;;  %s1845_s4 = inlined_call_operand.vmem [shape: f32[8,8,128], index: 4, kind: output, shape index: {}]  }
   0x1 LB: > { %s1026_s16 = sadd.s32 4294967295, %s1366_s15   ;;  %p1030_p0 = scmp.ge.s32.totalorder %s1366_s15, 1  ;;  %s1366_s15 = sphi %s1394_s15, %s14_s15  }
   0x2   : > { %p166_p1 = scmp.lt.s32.totalorder %s1366_s15, 3 }
   0x4   : > { %p167_p2 = pnand %p1030_p0, %p166_p1 }
   0x5   : > { %s1031_s17 = sshll.u32 (!%p167_p2), %s1026_s16, 2  ;;  %s201_s18 = ssub.s32 (!%p167_p2), 1, %s1026_s16 }
   0x6   : > { %170 = sbr.rel (%p167_p2) target bundleno = 1056 (0x420), region = 36  ;;  %p195_p3 = scmp.lt.s32.totalorder (!%p167_p2), %s1031_s17, 7 }
   0x7   : > { %s1034_s19 = sshll.u32 (!%p167_p2), %s201_s18, 2  ;;  %p1036_p5 = scmp.ne.s32.totalorder (!%p167_p2), %s1026_s16, 0 }
   0x8   : > { %p203_p4 = scmp.lt.s32.totalorder (!%p167_p2), %s1034_s19, 7 }
   0xd   : > { %s1847_s17 = smov (!%p195_p3, %s1031_s17), 7  ;;  %s1849_s19 = smov (!%p203_p4, %s1034_s19), 7 }
   0xe   : > { %s1054_s20 = sshll.u32 %s1847_s17, 5  ;;  %s1035_s24 = sshll.u32 %s1849_s19, 3  ;;  %v213_v0 = vld [vmem:[%s1843_s2] sm:$0xff] (!%p1036_p5) }
   0xf   : > { %s1405_s23 = scalar_lea.vmem %s1841_s0, %s1054_s20  ;;  %s1410_s27 = scalar_lea.vmem %s1845_s4, %s1035_s24  ;;  %v215_v1 = vld [vmem:[%s1844_s3] sm:$0xff] (!%p1036_p5)  ;;  %214 = vst [vmem:[#allocation2] sm:$0xff] (!%p1036_p5), %v213_v0 }
  0x10   : > { %212 = sbr.rel (%p1036_p5) target bundleno = 23 (0x17), region = 40  ;;  %216 = vst [vmem:[#allocation3] sm:$0xff] (!%p1036_p5), %v215_v1 }
  0x17 PF: > { %v218_v2 = vld [vmem:[%s1842_s1 + $0x8] sm:$0xff]  ;;  %v217_v4 = vld [vmem:[%s1842_s1] sm:$0xff]  ;;  %v1368_v9 = vmov 0.0   ;;  %v220_v14 = vld [vmem:[%s1842_s1 + $0x18] sm:$0xff] }
  0x18   : > { %v222_v3 = vld [vmem:[%s1842_s1 + $0x28] sm:$0xff]  ;;  %v221_v6 = vld [vmem:[%s1842_s1 + $0x20] sm:$0xff]  ;;  %351 = vmatprep.mubr.f32.mxu0 %v1368_v9  ;;  %422 = vmatprep.mubr.f32.mxu1 %v1368_v9  ;;  %v224_v15 = vld [vmem:[%s1842_s1 + $0x38] sm:$0xff] }
  0x19   : > { %v1427_v5 = vpack.c.bf16 %v222_v3, %v218_v2  ;;  %v226_v7 = vld [vmem:[%s1842_s1 + $0x48] sm:$0xff]  ;;  %v1440_v10 = vpack.c.bf16 %v221_v6, %v217_v4  ;;  %v225_v12 = vld [vmem:[%s1842_s1 + $0x40] sm:$0xff]  ;;  %v219_v16 = vld [vmem:[%s1842_s1 + $0x10] sm:$0xff]  ;;  %v1466_v19 = vpack.c.bf16 %v224_v15, %v220_v14 }
  0x1a   : > { %v230_v8 = vld [vmem:[%s1842_s1 + $0x68] sm:$0xff]  ;;  %v229_v13 = vld [vmem:[%s1842_s1 + $0x60] sm:$0xff]  ;;  %v223_v17 = vld [vmem:[%s1842_s1 + $0x30] sm:$0xff] }
  0x1b   : > { %v1442_v11 = vpack.c.bf16 %v230_v8, %v226_v7  ;;  %1056 = vmatprep.subr.bf16.mxu0 %v1427_v5  ;;  %v1464_v18 = vpack.c.bf16 %v229_v13, %v225_v12  ;;  %v1468_v20 = vpack.c.bf16 %v223_v17, %v219_v16  ;;  %v234_v21 = vld [vmem:[%s1842_s1 + $0x88] sm:$0xff]  ;;  %v233_v23 = vld [vmem:[%s1842_s1 + $0x80] sm:$0xff]  ;;  %v228_v26 = vld [vmem:[%s1842_s1 + $0x58] sm:$0xff]  ;;  %1088 = vmatprep.subr.bf16.mxu1 %v1466_v19 }
  0x1c   : > { %1058 = vmatpush1.bf16.msra.mxu0 %v1440_v10  ;;  %v238_v22 = vld [vmem:[%s1842_s1 + $0xa8] sm:$0xff]  ;;  %v237_v25 = vld [vmem:[%s1842_s1 + $0xa0] sm:$0xff]  ;;  %v232_v27 = vld [vmem:[%s1842_s1 + $0x78] sm:$0xff] }
  0x1d   : > { %1060 = vmatprep.subr.bf16.mxu0 %v1442_v11  ;;  %v1480_v24 = vpack.c.bf16 %v238_v22, %v234_v21  ;;  %v1492_v28 = vpack.c.bf16 %v232_v27, %v228_v26  ;;  %v227_v29 = vld [vmem:[%s1842_s1 + $0x50] sm:$0xff]  ;;  %v242_v31 = vld [vmem:[%s1842_s1 + $0xc8] sm:$0xff]  ;;  %1090 = vmatpush1.bf16.msra.mxu1 %v1468_v20  ;;  %v1510_v34 = vpack.c.bf16 %v237_v25, %v233_v23  ;;  %v236_v35 = vld [vmem:[%s1842_s1 + $0x98] sm:$0xff] }
  0x1e   : > { %v231_v30 = vld [vmem:[%s1842_s1 + $0x70] sm:$0xff]  ;;  %v246_v33 = vld [vmem:[%s1842_s1 + $0xe8] sm:$0xff]  ;;  %v240_v36 = vld [vmem:[%s1842_s1 + $0xb8] sm:$0xff] }
  0x1f   : > { %v1504_v32 = vpack.c.bf16 %v231_v30, %v227_v29  ;;  %1092 = vmatprep.subr.bf16.mxu1 %v1492_v28  ;;  %v235_v37 = vld [vmem:[%s1842_s1 + $0x90] sm:$0xff]  ;;  %v1523_v38 = vpack.c.bf16 %v246_v33, %v242_v31  ;;  %v241_v39 = vld [vmem:[%s1842_s1 + $0xc0] sm:$0xff]  ;;  %v1531_v41 = vpack.c.bf16 %v240_v36, %v236_v35  ;;  %v250_v43 = vld [vmem:[%s1842_s1 + $0x108] sm:$0xff] }
  0x20   : > { %1062 = vmatpush1.bf16.msra.mxu0 %v1464_v18  ;;  %v245_v40 = vld [vmem:[%s1842_s1 + $0xe0] sm:$0xff]  ;;  %v239_v42 = vld [vmem:[%s1842_s1 + $0xb0] sm:$0xff]  ;;  %v254_v44 = vld [vmem:[%s1842_s1 + $0x128] sm:$0xff] }
  0x21   : > { %1064 = vmatprep.subr.bf16.mxu0 %v1480_v24  ;;  %v244_v45 = vld [vmem:[%s1842_s1 + $0xd8] sm:$0xff]  ;;  %1094 = vmatpush1.bf16.msra.mxu1 %v1504_v32  ;;  %v1546_v46 = vpack.c.bf16 %v239_v42, %v235_v37  ;;  %v1552_v48 = vpack.c.bf16 %v245_v40, %v241_v39  ;;  %v249_v49 = vld [vmem:[%s1842_s1 + $0x100] sm:$0xff]  ;;  %v243_v51 = vld [vmem:[%s1842_s1 + $0xd0] sm:$0xff]  ;;  %v1567_v53 = vpack.c.bf16 %v254_v44, %v250_v43 }
  0x22   : > { %v248_v47 = vld [vmem:[%s1842_s1 + $0xf8] sm:$0xff]  ;;  %1096 = vmatprep.subr.bf16.mxu1 %v1531_v41  ;;  %v247_v52 = vld [vmem:[%s1842_s1 + $0xf0] sm:$0xff]  ;;  %v253_v54 = vld [vmem:[%s1842_s1 + $0x120] sm:$0xff] }
  0x23   : > { %v1558_v50 = vpack.c.bf16 %v248_v47, %v244_v45  ;;  %v252_v55 = vld [vmem:[%s1842_s1 + $0x118] sm:$0xff]  ;;  %v258_v57 = vld [vmem:[%s1842_s1 + $0x148] sm:$0xff]  ;;  %v1585_v59 = vpack.c.bf16 %v247_v52, %v243_v51  ;;  %v1588_v60 = vpack.c.bf16 %v253_v54, %v249_v49  ;;  %v257_v61 = vld [vmem:[%s1842_s1 + $0x140] sm:$0xff] }
  0x24   : > { %1066 = vmatpush1.bf16.msra.mxu0 %v1510_v34  ;;  %v256_v56 = vld [vmem:[%s1842_s1 + $0x138] sm:$0xff]  ;;  %v262_v58 = vld [vmem:[%s1842_s1 + $0x168] sm:$0xff]  ;;  %v251_v63 = vld [vmem:[%s1842_s1 + $0x110] sm:$0xff] }
  0x25   : > { %1068 = vmatprep.subr.bf16.mxu0 %v1523_v38  ;;  %1098 = vmatpush1.bf16.msra.mxu1 %v1546_v46  ;;  %v1594_v62 = vpack.c.bf16 %v256_v56, %v252_v55  ;;  %v255_v0 = vld [vmem:[%s1842_s1 + $0x130] sm:$0xff]  ;;  %v1603_v1 = vpack.c.bf16 %v262_v58, %v258_v57  ;;  %v261_v2 = vld [vmem:[%s1842_s1 + $0x160] sm:$0xff]  ;;  %v260_v3 = vld [vmem:[%s1842_s1 + $0x158] sm:$0xff] }
  0x26   : > { %1100 = vmatprep.subr.bf16.mxu1 %v1558_v50  ;;  %v264_v4 = vld [vmem:[%s1842_s1 + $0x178] sm:$0xff]  ;;  %v266_v6 = vld [vmem:[%s1842_s1 + $0x188] sm:$0xff]  ;;  %v1621_v8 = vpack.c.bf16 %v255_v0, %v251_v63  ;;  %v1624_v12 = vpack.c.bf16 %v261_v2, %v257_v61  ;;  %v265_v13 = vld [vmem:[%s1842_s1 + $0x180] sm:$0xff] }
  0x27   : > { %v270_v7 = vld [vmem:[%s1842_s1 + $0x1a8] sm:$0xff]  ;;  %v1630_v14 = vpack.c.bf16 %v264_v4, %v260_v3  ;;  %v259_v15 = vld [vmem:[%s1842_s1 + $0x150] sm:$0xff]  ;;  %v269_v21 = vld [vmem:[%s1842_s1 + $0x1a0] sm:$0xff] }
  0x28   : > { %1070 = vmatpush1.bf16.msra.mxu0 %v1552_v48  ;;  %v263_v16 = vld [vmem:[%s1842_s1 + $0x170] sm:$0xff]  ;;  %v1639_v17 = vpack.c.bf16 %v270_v7, %v266_v6  ;;  %v268_v22 = vld [vmem:[%s1842_s1 + $0x198] sm:$0xff]  ;;  %v274_v25 = vld [vmem:[%s1842_s1 + $0x1c8] sm:$0xff]  ;;  %v1660_v29 = vpack.c.bf16 %v269_v21, %v265_v13 }
  0x29   : > { %1072 = vmatprep.subr.bf16.mxu0 %v1567_v53  ;;  %1102 = vmatpush1.bf16.msra.mxu1 %v1585_v59  ;;  %v272_v23 = vld [vmem:[%s1842_s1 + $0x1b8] sm:$0xff]  ;;  %v278_v26 = vld [vmem:[%s1842_s1 + $0x1e8] sm:$0xff]  ;;  %v1657_v27 = vpack.c.bf16 %v263_v16, %v259_v15  ;;  %v273_v30 = vld [vmem:[%s1842_s1 + $0x1c0] sm:$0xff] }
  0x2a   : > { %1104 = vmatprep.subr.bf16.mxu1 %v1594_v62  ;;  %v1666_v31 = vpack.c.bf16 %v272_v23, %v268_v22  ;;  %v267_v33 = vld [vmem:[%s1842_s1 + $0x190] sm:$0xff]  ;;  %v1675_v36 = vpack.c.bf16 %v278_v26, %v274_v25  ;;  %v277_v37 = vld [vmem:[%s1842_s1 + $0x1e0] sm:$0xff]  ;;  %v276_v39 = vld [vmem:[%s1842_s1 + $0x1d8] sm:$0xff] }
  0x2b   : > { %v271_v35 = vld [vmem:[%s1842_s1 + $0x1b0] sm:$0xff]  ;;  %v280_v40 = vld [vmem:[%s1842_s1 + $0x1f8] sm:$0xff]  ;;  %v1690_v43 = vpack.c.bf16 %v277_v37, %v273_v30  ;;  %v281_v51 = vld [vmem:[#allocation2] sm:$0xff] }
  0x2c   : > { %1074 = vmatpush1.bf16.msra.mxu0 %v1588_v60  ;;  %v1687_v42 = vpack.c.bf16 %v271_v35, %v267_v33  ;;  %v1693_v44 = vpack.c.bf16 %v280_v40, %v276_v39  ;;  %v275_v45 = vld [vmem:[%s1842_s1 + $0x1d0] sm:$0xff]  ;;  %v283_v52 = vld [vmem:[%s1405_s23] sm:$0xff]  ;;  %v284_v54 = vld [vmem:[%s1405_s23 + $0x8] sm:$0xff] }
  0x2d   : > { %1076 = vmatprep.subr.bf16.mxu0 %v1603_v1  ;;  %1106 = vmatpush1.bf16.msra.mxu1 %v1621_v8  ;;  %v279_v47 = vld [vmem:[%s1842_s1 + $0x1f0] sm:$0xff]  ;;  %v286_v6 = vld [vmem:[%s1405_s23 + $0x18] sm:$0xff]  ;;  %v282_v26 = vld [vmem:[#allocation3] sm:$0xff] }
  0x2e   : > { %1108 = vmatprep.subr.bf16.mxu1 %v1630_v14  ;;  %v1703_v49 = vpack.c.bf16 %v279_v47, %v275_v45  ;;  %v285_v58 = vld [vmem:[%s1405_s23 + $0x10] sm:$0xff] }
  0x30   : > { %1078 = vmatpush1.bf16.msra.mxu0 %v1624_v12 }
  0x31   : > { %1080 = vmatprep.subr.bf16.mxu0 %v1639_v17  ;;  %1110 = vmatpush1.bf16.msra.mxu1 %v1657_v27 }
  0x32   : > { %1112 = vmatprep.subr.bf16.mxu1 %v1666_v31 }
  0x34   : > { %1082 = vmatpush1.bf16.msra.mxu0 %v1660_v29 }
  0x35   : > { %1084 = vmatprep.subr.bf16.mxu0 %v1675_v36  ;;  %1114 = vmatpush1.bf16.msra.mxu1 %v1687_v42 }
  0x36   : > { %1116 = vmatprep.subr.bf16.mxu1 %v1693_v44 }
  0x38   : > { %1086 = vmatpush1.bf16.msra.mxu0 %v1690_v43 }
  0x39   : > { %1120 = vmatprep.subr.bf16.mxu0 %v1427_v5  ;;  %1118 = vmatpush1.bf16.msra.mxu1 %v1703_v49 }
  0x3a   : > { %1152 = vmatprep.subr.bf16.mxu1 %v1466_v19 }
  0x3b   : > { %352 = vmatmul.mubr.f32.vlgmr.msra.gmra.mrb[0].mxu0 %v281_v51 }
  0x3c   : > { %1122 = vmatpush1.bf16.msra.mxu0 %v1440_v10  ;;  %522 = vmatprep.mubr.f32.mxu0 %v1368_v9 }
  0x3d   : > { %1124 = vmatprep.subr.bf16.mxu0 %v1442_v11  ;;  %423 = vmatmul.mubr.f32.vlgmr.msra.gmra.mrb[0].mxu1 %v281_v51 }
  0x3e   : > { %1154 = vmatpush1.bf16.msra.mxu1 %v1468_v20  ;;  %593 = vmatprep.mubr.f32.mxu1 %v1368_v9 }
  0x3f   : > { %1156 = vmatprep.subr.bf16.mxu1 %v1492_v28 }
  0x40   : > { %1126 = vmatpush1.bf16.msra.mxu0 %v1464_v18 }
  0x41   : > { %1128 = vmatprep.subr.bf16.mxu0 %v1480_v24 }
  0x42   : > { %1158 = vmatpush1.bf16.msra.mxu1 %v1504_v32 }
  0x43   : > { %1160 = vmatprep.subr.bf16.mxu1 %v1531_v41 }
  0x44   : > { %1130 = vmatpush1.bf16.msra.mxu0 %v1510_v34 }
  0x45   : > { %1132 = vmatprep.subr.bf16.mxu0 %v1523_v38 }
  0x46   : > { %1162 = vmatpush1.bf16.msra.mxu1 %v1546_v46 }
  0x47   : > { %1164 = vmatprep.subr.bf16.mxu1 %v1558_v50 }
  0x48   : > { %1134 = vmatpush1.bf16.msra.mxu0 %v1552_v48 }
  0x49   : > { %1136 = vmatprep.subr.bf16.mxu0 %v1567_v53 }
  0x4a   : > { %1166 = vmatpush1.bf16.msra.mxu1 %v1585_v59 }
  0x4b   : > { %1168 = vmatprep.subr.bf16.mxu1 %v1594_v62 }
  0x4c   : > { %1138 = vmatpush1.bf16.msra.mxu0 %v1588_v60 }
  0x4d   : > { %1140 = vmatprep.subr.bf16.mxu0 %v1603_v1 }
  0x4e   : > { %1170 = vmatpush1.bf16.msra.mxu1 %v1621_v8 }
  0x4f   : > { %1172 = vmatprep.subr.bf16.mxu1 %v1630_v14 }
  0x50   : > { %1142 = vmatpush1.bf16.msra.mxu0 %v1624_v12 }
  0x51   : > { %1144 = vmatprep.subr.bf16.mxu0 %v1639_v17 }
  0x52   : > { %1174 = vmatpush1.bf16.msra.mxu1 %v1657_v27 }
  0x53   : > { %1176 = vmatprep.subr.bf16.mxu1 %v1666_v31 }
  0x54   : > { %1146 = vmatpush1.bf16.msra.mxu0 %v1660_v29 }
  0x55   : > { %1148 = vmatprep.subr.bf16.mxu0 %v1675_v36 }
  0x56   : > { %1178 = vmatpush1.bf16.msra.mxu1 %v1687_v42 }
  0x57   : > { %1180 = vmatprep.subr.bf16.mxu1 %v1693_v44 }
  0x58   : > { %1150 = vmatpush1.bf16.msra.mxu0 %v1690_v43 }
  0x59   : > { %1184 = vmatprep.subr.bf16.mxu0 %v1427_v5 }
  0x5a   : > { %1182 = vmatpush1.bf16.msra.mxu1 %v1703_v49 }
  0x5b   : > { %1216 = vmatprep.subr.bf16.mxu1 %v1466_v19 }
 0x10e   : > { %v353_v55 = vpop.f32.mrb[0].mxu0 }
 0x10f   : > { %v429_v56 = vadd.f32 %v353_v55, %v283_v52  ;;  %v355_v57 = vpop.f32.mrb[1].mxu0  ;;  %v1038_v52 = vld [vmem:[%s1405_s23 + $0x20] sm:$0xff] }
 0x110   : > { %v430_v61 = vadd.f32 %v355_v57, %v284_v54  ;;  %v424_v0 = vpop.f32.mrb[0].mxu1  ;;  %v1039_v54 = vld [vmem:[%s1405_s23 + $0x28] sm:$0xff] }
 0x111   : > { %v433_v63 = vmul.f32 0.5, %v429_v56  ;;  %v431_v3 = vadd.f32 %v424_v0, %v285_v58  ;;  %v426_v4 = vpop.f32.mrb[1].mxu1 }
 0x112   : > { %v437_v2 = vmul.f32 0.5, %v430_v61  ;;  %v432_v7 = vadd.f32 %v426_v4, %v286_v6  ;;  %v1041_v6 = vld [vmem:[%s1405_s23 + $0x38] sm:$0xff] }
 0x113   : > { %1320 = vtanh.f32 %v433_v63  ;;  %v1040_v63 = vld [vmem:[%s1405_s23 + $0x30] sm:$0xff] }
 0x114   : > { %1322 = vtanh.f32 %v437_v2  ;;  %v442_v13 = vmul.f32 0.5, %v432_v7 }
 0x115   : > { %1324 = vtanh.f32 %v431_v3 }
 0x116   : > { %1326 = vtanh.f32 %v442_v13 }
 0x11d   : > { %v1321_v15 = vpop.eup %1320 }
 0x11e   : > { %v1323_v16 = vpop.eup %1322  ;;  %v435_v21 = vmul.f32 0.5, %v1321_v15 }
 0x11f   : > { %v1325_v22 = vpop.eup %1324  ;;  %v439_v23 = vmul.f32 0.5, %v1323_v16 }
 0x120   : > { %v436_v25 = vadd.f32 0.5, %v435_v21  ;;  %v1327_v39 = vpop.eup %1326 }
 0x121   : > { %v440_v30 = vadd.f32 0.5, %v439_v23  ;;  %v444_v40 = vmul.f32 0.5, %v1327_v39 }
 0x122   : > { %v447_v33 = vmul.f32 %v1325_v22, %v436_v25 }
 0x123   : > { %v446_v35 = vmul.f32 %v440_v30, %v282_v26  ;;  %v445_v45 = vadd.f32 0.5, %v444_v40 }
 0x125   : > { %v1748_v37 = vadd.f32 %v447_v33, %v446_v35 }
 0x127   : > { %1328 = vtanh.f32 %v1748_v37 }
 0x131   : > { %v1329_v47 = vpop.eup %1328 }
 0x132   : > { %v450_v51 = vmul.f32 %v1329_v47, %v445_v45 }
 0x134   : > { %1037 = vst [vmem:[%s1410_s27 + $0x18] sm:$0xff] %v450_v51  ;;  %523 = vmatmul.mubr.f32.vlgmr.msra.gmra.mrb[2].mxu0 %v450_v51  ;;  %594 = vmatmul.mubr.f32.vlgmr.msra.gmra.mrb[2].mxu1 %v450_v51 }
 0x135   : > { %1186 = vmatpush1.bf16.msra.mxu0 %v1440_v10  ;;  %1218 = vmatpush1.bf16.msra.mxu1 %v1468_v20 }
 0x136   : > { %1188 = vmatprep.subr.bf16.mxu0 %v1442_v11  ;;  %1220 = vmatprep.subr.bf16.mxu1 %v1492_v28 }
 0x137   : > { %693 = vmatprep.mubr.f32.mxu0 %v1368_v9  ;;  %764 = vmatprep.mubr.f32.mxu1 %v1368_v9 }
 0x139   : > { %1190 = vmatpush1.bf16.msra.mxu0 %v1464_v18  ;;  %1222 = vmatpush1.bf16.msra.mxu1 %v1504_v32 }
 0x13a   : > { %1192 = vmatprep.subr.bf16.mxu0 %v1480_v24  ;;  %1224 = vmatprep.subr.bf16.mxu1 %v1531_v41 }
 0x13d   : > { %1194 = vmatpush1.bf16.msra.mxu0 %v1510_v34  ;;  %1226 = vmatpush1.bf16.msra.mxu1 %v1546_v46 }
 0x13e   : > { %1196 = vmatprep.subr.bf16.mxu0 %v1523_v38  ;;  %1228 = vmatprep.subr.bf16.mxu1 %v1558_v50 }
 0x141   : > { %1198 = vmatpush1.bf16.msra.mxu0 %v1552_v48  ;;  %1230 = vmatpush1.bf16.msra.mxu1 %v1585_v59 }
 0x142   : > { %1200 = vmatprep.subr.bf16.mxu0 %v1567_v53  ;;  %1232 = vmatprep.subr.bf16.mxu1 %v1594_v62 }
 0x145   : > { %1202 = vmatpush1.bf16.msra.mxu0 %v1588_v60  ;;  %1234 = vmatpush1.bf16.msra.mxu1 %v1621_v8 }
 0x146   : > { %1204 = vmatprep.subr.bf16.mxu0 %v1603_v1  ;;  %1236 = vmatprep.subr.bf16.mxu1 %v1630_v14 }
 0x149   : > { %1206 = vmatpush1.bf16.msra.mxu0 %v1624_v12  ;;  %1238 = vmatpush1.bf16.msra.mxu1 %v1657_v27 }
 0x14a   : > { %1208 = vmatprep.subr.bf16.mxu0 %v1639_v17  ;;  %1240 = vmatprep.subr.bf16.mxu1 %v1666_v31 }
 0x14d   : > { %1210 = vmatpush1.bf16.msra.mxu0 %v1660_v29  ;;  %1242 = vmatpush1.bf16.msra.mxu1 %v1687_v42 }
 0x14e   : > { %1212 = vmatprep.subr.bf16.mxu0 %v1675_v36  ;;  %1244 = vmatprep.subr.bf16.mxu1 %v1693_v44 }
 0x151   : > { %1214 = vmatpush1.bf16.msra.mxu0 %v1690_v43  ;;  %1246 = vmatpush1.bf16.msra.mxu1 %v1703_v49 }
 0x152   : > { %1248 = vmatprep.subr.bf16.mxu0 %v1427_v5  ;;  %1280 = vmatprep.subr.bf16.mxu1 %v1466_v19 }
 0x207   : > { %v524_v55 = vpop.f32.mrb[2].mxu0  ;;  %v595_v56 = vpop.f32.mrb[2].mxu1 }
 0x208   : > { %v600_v57 = vadd.f32 %v1038_v52, %v524_v55  ;;  %v526_v58 = vpop.f32.mrb[3].mxu0  ;;  %v597_v61 = vpop.f32.mrb[3].mxu1  ;;  %v602_v4 = vadd.f32 %v1040_v63, %v595_v56  ;;  %v1050_v56 = vld [vmem:[%s1405_s23 + $0x70] sm:$0xff] }
 0x209   : > { %v601_v0 = vadd.f32 %v1039_v54, %v526_v58  ;;  %v603_v5 = vadd.f32 %v1041_v6, %v597_v61 }
 0x20a   : > { %v604_v2 = vmul.f32 0.5, %v600_v57 }
 0x20b   : > { %v608_v3 = vmul.f32 0.5, %v601_v0  ;;  %v613_v7 = vmul.f32 0.5, %v603_v5  ;;  %v1051_v0 = vld [vmem:[%s1405_s23 + $0x78] sm:$0xff] }
 0x20c   : > { %1330 = vtanh.f32 %v604_v2 }
 0x20d   : > { %1332 = vtanh.f32 %v608_v3 }
 0x20e   : > { %1334 = vtanh.f32 %v602_v4 }
 0x20f   : > { %1336 = vtanh.f32 %v613_v7 }
 0x216   : > { %v1331_v13 = vpop.eup %1330 }
 0x217   : > { %v1333_v19 = vpop.eup %1332  ;;  %v606_v15 = vmul.f32 0.5, %v1331_v13 }
 0x218   : > { %v610_v16 = vmul.f32 0.5, %v1333_v19  ;;  %v1335_v22 = vpop.eup %1334 }
 0x219   : > { %v607_v21 = vadd.f32 0.5, %v606_v15  ;;  %v1337_v33 = vpop.eup %1336 }
 0x21a   : > { %v611_v23 = vadd.f32 0.5, %v610_v16  ;;  %v615_v35 = vmul.f32 0.5, %v1337_v33 }
 0x21b   : > { %v618_v25 = vmul.f32 %v1335_v22, %v607_v21 }
 0x21c   : > { %v617_v26 = vmul.f32 %v611_v23, %v1748_v37  ;;  %v616_v39 = vadd.f32 0.5, %v615_v35  ;;  %v1049_v37 = vld [vmem:[%s1405_s23 + $0x68] sm:$0xff] }
 0x21e   : > { %v1791_v30 = vadd.f32 %v618_v25, %v617_v26 }
 0x220   : > { %1338 = vtanh.f32 %v1791_v30 }
 0x22a   : > { %v1339_v40 = vpop.eup %1338 }
 0x22b   : > { %v621_v45 = vmul.f32 %v1339_v40, %v616_v39 }
 0x22d   : > { %1042 = vst [vmem:[%s1410_s27 + $0x10] sm:$0xff] %v621_v45  ;;  %694 = vmatmul.mubr.f32.vlgmr.msra.gmra.mrb[4].mxu0 %v621_v45  ;;  %765 = vmatmul.mubr.f32.vlgmr.msra.gmra.mrb[4].mxu1 %v621_v45 }
 0x22e   : > { %1250 = vmatpush1.bf16.msra.mxu0 %v1440_v10  ;;  %1282 = vmatpush1.bf16.msra.mxu1 %v1468_v20  ;;  %v1044_v10 = vld [vmem:[%s1405_s23 + $0x48] sm:$0xff] }
 0x22f   : > { %1252 = vmatprep.subr.bf16.mxu0 %v1442_v11  ;;  %1284 = vmatprep.subr.bf16.mxu1 %v1492_v28 }
 0x230   : > { %864 = vmatprep.mubr.f32.mxu0 %v1368_v9  ;;  %935 = vmatprep.mubr.f32.mxu1 %v1368_v9  ;;  %v1043_v9 = vld [vmem:[%s1405_s23 + $0x40] sm:$0xff] }
 0x232   : > { %1254 = vmatpush1.bf16.msra.mxu0 %v1464_v18  ;;  %1286 = vmatpush1.bf16.msra.mxu1 %v1504_v32  ;;  %v1045_v32 = vld [vmem:[%s1405_s23 + $0x50] sm:$0xff] }
 0x233   : > { %1256 = vmatprep.subr.bf16.mxu0 %v1480_v24  ;;  %1288 = vmatprep.subr.bf16.mxu1 %v1531_v41 }
 0x236   : > { %1258 = vmatpush1.bf16.msra.mxu0 %v1510_v34  ;;  %1290 = vmatpush1.bf16.msra.mxu1 %v1546_v46 }
 0x237   : > { %1260 = vmatprep.subr.bf16.mxu0 %v1523_v38  ;;  %1292 = vmatprep.subr.bf16.mxu1 %v1558_v50 }
 0x23a   : > { %1262 = vmatpush1.bf16.msra.mxu0 %v1552_v48  ;;  %1294 = vmatpush1.bf16.msra.mxu1 %v1585_v59  ;;  %v1046_v48 = vld [vmem:[%s1405_s23 + $0x58] sm:$0xff] }
 0x23b   : > { %1264 = vmatprep.subr.bf16.mxu0 %v1567_v53  ;;  %1296 = vmatprep.subr.bf16.mxu1 %v1594_v62 }
 0x23e   : > { %1266 = vmatpush1.bf16.msra.mxu0 %v1588_v60  ;;  %1298 = vmatpush1.bf16.msra.mxu1 %v1621_v8 }
 0x23f   : > { %1268 = vmatprep.subr.bf16.mxu0 %v1603_v1  ;;  %1300 = vmatprep.subr.bf16.mxu1 %v1630_v14 }
 0x242   : > { %1270 = vmatpush1.bf16.msra.mxu0 %v1624_v12  ;;  %1302 = vmatpush1.bf16.msra.mxu1 %v1657_v27 }
 0x243   : > { %1272 = vmatprep.subr.bf16.mxu0 %v1639_v17  ;;  %1304 = vmatprep.subr.bf16.mxu1 %v1666_v31 }
 0x246   : > { %1274 = vmatpush1.bf16.msra.mxu0 %v1660_v29  ;;  %1306 = vmatpush1.bf16.msra.mxu1 %v1687_v42 }
 0x247   : > { %1276 = vmatprep.subr.bf16.mxu0 %v1675_v36  ;;  %1308 = vmatprep.subr.bf16.mxu1 %v1693_v44 }
 0x24a   : > { %1278 = vmatpush1.bf16.msra.mxu0 %v1690_v43  ;;  %1310 = vmatpush1.bf16.msra.mxu1 %v1703_v49  ;;  %v1048_v49 = vld [vmem:[%s1405_s23 + $0x60] sm:$0xff] }
 0x300   : > { %v695_v11 = vpop.f32.mrb[4].mxu0  ;;  %v766_v18 = vpop.f32.mrb[4].mxu1 }
 0x301   : > { %v771_v20 = vadd.f32 %v1043_v9, %v695_v11  ;;  %v697_v24 = vpop.f32.mrb[5].mxu0  ;;  %v768_v28 = vpop.f32.mrb[5].mxu1  ;;  %v773_v46 = vadd.f32 %v1045_v32, %v766_v18 }
 0x302   : > { %v772_v34 = vadd.f32 %v1044_v10, %v697_v24  ;;  %v774_v50 = vadd.f32 %v1046_v48, %v768_v28 }
 0x303   : > { %v775_v38 = vmul.f32 0.5, %v771_v20 }
 0x304   : > { %v779_v41 = vmul.f32 0.5, %v772_v34  ;;  %v784_v53 = vmul.f32 0.5, %v774_v50 }
 0x305   : > { %1340 = vtanh.f32 %v775_v38 }
 0x306   : > { %1342 = vtanh.f32 %v779_v41 }
 0x307   : > { %1344 = vtanh.f32 %v773_v46 }
 0x308   : > { %1346 = vtanh.f32 %v784_v53 }
 0x30f   : > { %v1341_v59 = vpop.eup %1340 }
 0x310   : > { %v1343_v60 = vpop.eup %1342  ;;  %v777_v62 = vmul.f32 0.5, %v1341_v59 }
 0x311   : > { %v781_v1 = vmul.f32 0.5, %v1343_v60  ;;  %v1345_v12 = vpop.eup %1344 }
 0x312   : > { %v778_v8 = vadd.f32 0.5, %v777_v62  ;;  %v1347_v31 = vpop.eup %1346 }
 0x313   : > { %v782_v14 = vadd.f32 0.5, %v781_v1  ;;  %v786_v36 = vmul.f32 0.5, %v1347_v31 }
 0x314   : > { %v789_v17 = vmul.f32 %v1345_v12, %v778_v8 }
 0x315   : > { %v788_v27 = vmul.f32 %v782_v14, %v1791_v30  ;;  %v787_v42 = vadd.f32 0.5, %v786_v36 }
 0x317   : > { %v790_v29 = vadd.f32 %v789_v17, %v788_v27 }
 0x319   : > { %1348 = vtanh.f32 %v790_v29 }
 0x323   : > { %v1349_v43 = vpop.eup %1348 }
 0x324   : > { %v792_v44 = vmul.f32 %v1349_v43, %v787_v42 }
 0x326   : > { %1047 = vst [vmem:[%s1410_s27 + $0x8] sm:$0xff] %v792_v44  ;;  %865 = vmatmul.mubr.f32.vlgmr.msra.gmra.mrb[6].mxu0 %v792_v44  ;;  %936 = vmatmul.mubr.f32.vlgmr.msra.gmra.mrb[6].mxu1 %v792_v44 }
 0x3f9   : > { %v866_v47 = vpop.f32.mrb[6].mxu0  ;;  %v937_v51 = vpop.f32.mrb[6].mxu1 }
 0x3fa   : > { %v942_v52 = vadd.f32 %v1048_v49, %v866_v47  ;;  %v868_v54 = vpop.f32.mrb[7].mxu0  ;;  %v939_v55 = vpop.f32.mrb[7].mxu1  ;;  %v944_v63 = vadd.f32 %v1050_v56, %v937_v51 }
 0x3fb   : > { %v943_v57 = vadd.f32 %v1049_v37, %v868_v54  ;;  %v945_v2 = vadd.f32 %v1051_v0, %v939_v55 }
 0x3fc   : > { %v946_v58 = vmul.f32 0.5, %v942_v52 }
 0x3fd   : > { %v950_v61 = vmul.f32 0.5, %v943_v57  ;;  %v955_v3 = vmul.f32 0.5, %v945_v2 }
 0x3fe   : > { %1350 = vtanh.f32 %v946_v58 }
 0x3ff   : > { %1352 = vtanh.f32 %v950_v61 }
 0x400   : > { %1354 = vtanh.f32 %v944_v63 }
 0x401   : > { %1356 = vtanh.f32 %v955_v3 }
 0x408   : > { %v1351_v4 = vpop.eup %1350 }
 0x409   : > { %v1353_v6 = vpop.eup %1352  ;;  %v948_v5 = vmul.f32 0.5, %v1351_v4 }
 0x40a   : > { %v952_v7 = vmul.f32 0.5, %v1353_v6  ;;  %v1355_v19 = vpop.eup %1354 }
 0x40b   : > { %v949_v13 = vadd.f32 0.5, %v948_v5  ;;  %v1357_v23 = vpop.eup %1356 }
 0x40c   : > { %v953_v15 = vadd.f32 0.5, %v952_v7  ;;  %v957_v25 = vmul.f32 0.5, %v1357_v23 }
 0x40d   : > { %v960_v16 = vmul.f32 %v1355_v19, %v949_v13 }
 0x40e   : > { %v959_v21 = vmul.f32 %v953_v15, %v790_v29  ;;  %v958_v26 = vadd.f32 0.5, %v957_v25 }
 0x410   : > { %v961_v22 = vadd.f32 %v960_v16, %v959_v21 }
 0x412   : > { %1358 = vtanh.f32 %v961_v22  ;;  %966 = vst [vmem:[#allocation3] sm:$0xff] %v961_v22 }
 0x41c   : > { %v1359_v30 = vpop.eup %1358 }
 0x41d   : > { %v963_v33 = vmul.f32 %v1359_v30, %v958_v26 }
 0x41f   : > { %964 = vst [vmem:[%s1410_s27] sm:$0xff] %v963_v33  ;;  %965 = vst [vmem:[#allocation2] sm:$0xff] %v963_v33 }
 0x420 PF: > { %s14_s15 = sadd.s32 1, %s1366_s15  }
 0x421   : > { %p11_p6 = scmp.ge.s32.totalorder %s14_s15, 4  }
 0x423   :  { %13 = sbr.rel (!%p11_p6) target bundleno = 1 (0x1), region = 76 }

// kernel: decoder_rnn_forward.2
= control target key start
LH: loop header
LB: loop body
LE: loop exit
PB: predicated region body
PF: predicated region fallthrough
CT: control target
= control target key end

     0   :  { %s1386_s15 = smov 0   ;;  %s1833_s0 = inlined_call_operand.vmem [shape: f32[8,8,512], index: 0, kind: input, shape index: {}]   ;;  %s1834_s1 = inlined_call_operand.vmem [shape: f32[128,512], index: 1, kind: input, shape index: {}]   ;;  %s1835_s2 = inlined_call_operand.vmem [shape: f32[8,128], index: 2, kind: input, shape index: {}]   ;;  %s1836_s3 = inlined_call_operand.vmem [shape: f32[8,128], index: 3, kind: input, shape index: {}]   ;;  %s1837_s4 = inlined_call_operand.vmem [shape: f32[8,8,128], index: 4, kind: output, shape index: {}]  }
   0x1 LB: > { %s1018_s16 = sadd.s32 4294967295, %s1358_s15   ;;  %p1022_p0 = scmp.ge.s32.totalorder %s1358_s15, 1  ;;  %s1358_s15 = sphi %s1386_s15, %s14_s15  }
   0x2   : > { %p164_p1 = scmp.lt.s32.totalorder %s1358_s15, 3 }
   0x4   : > { %p165_p2 = pnand %p1022_p0, %p164_p1 }
   0x5   : > { %s1023_s17 = sshll.u32 (!%p165_p2), %s1018_s16, 2  ;;  %p1028_p4 = scmp.ne.s32.totalorder (!%p165_p2), %s1018_s16, 0 }
   0x6   : > { %168 = sbr.rel (%p165_p2) target bundleno = 1053 (0x41d), region = 36  ;;  %p192_p3 = scmp.lt.s32.totalorder (!%p165_p2), %s1023_s17, 7 }
   0xd   : > { %s1839_s17 = smov (!%p192_p3, %s1023_s17), 7  ;;  %207 = sbr.rel (%p1028_p4) target bundleno = 20 (0x14), region = 40 }
   0xe   : > { %s1046_s18 = sshll.u32 %s1839_s17, 5  ;;  %s1027_s19 = sshll.u32 %s1839_s17, 3  ;;  %v208_v0 = vld [vmem:[%s1835_s2] sm:$0xff] (!%p1028_p4) }
   0xf   : > { %s1397_s22 = scalar_lea.vmem %s1833_s0, %s1046_s18  ;;  %s1402_s25 = scalar_lea.vmem %s1837_s4, %s1027_s19  ;;  %v210_v1 = vld [vmem:[%s1836_s3] sm:$0xff] (!%p1028_p4)  ;;  %209 = vst [vmem:[#allocation2] sm:$0xff] (!%p1028_p4), %v208_v0 }
  0x10   : > { %211 = vst [vmem:[#allocation3] sm:$0xff] (!%p1028_p4), %v210_v1 }
  0x14 PF: > { %v213_v2 = vld [vmem:[%s1834_s1 + $0x8] sm:$0xff]  ;;  %v212_v4 = vld [vmem:[%s1834_s1] sm:$0xff]  ;;  %v1360_v9 = vmov 0.0   ;;  %v215_v14 = vld [vmem:[%s1834_s1 + $0x18] sm:$0xff] }
  0x15   : > { %v217_v3 = vld [vmem:[%s1834_s1 + $0x28] sm:$0xff]  ;;  %v216_v6 = vld [vmem:[%s1834_s1 + $0x20] sm:$0xff]  ;;  %346 = vmatprep.mubr.f32.mxu0 %v1360_v9  ;;  %417 = vmatprep.mubr.f32.mxu1 %v1360_v9  ;;  %v219_v15 = vld [vmem:[%s1834_s1 + $0x38] sm:$0xff] }
  0x16   : > { %v1419_v5 = vpack.c.bf16 %v217_v3, %v213_v2  ;;  %v221_v7 = vld [vmem:[%s1834_s1 + $0x48] sm:$0xff]  ;;  %v1432_v10 = vpack.c.bf16 %v216_v6, %v212_v4  ;;  %v220_v12 = vld [vmem:[%s1834_s1 + $0x40] sm:$0xff]  ;;  %v214_v16 = vld [vmem:[%s1834_s1 + $0x10] sm:$0xff]  ;;  %v1458_v19 = vpack.c.bf16 %v219_v15, %v215_v14 }
  0x17   : > { %v225_v8 = vld [vmem:[%s1834_s1 + $0x68] sm:$0xff]  ;;  %v224_v13 = vld [vmem:[%s1834_s1 + $0x60] sm:$0xff]  ;;  %v218_v17 = vld [vmem:[%s1834_s1 + $0x30] sm:$0xff] }
  0x18   : > { %v1434_v11 = vpack.c.bf16 %v225_v8, %v221_v7  ;;  %1048 = vmatprep.subr.bf16.mxu0 %v1419_v5  ;;  %v1456_v18 = vpack.c.bf16 %v224_v13, %v220_v12  ;;  %v1460_v20 = vpack.c.bf16 %v218_v17, %v214_v16  ;;  %v229_v21 = vld [vmem:[%s1834_s1 + $0x88] sm:$0xff]  ;;  %v228_v23 = vld [vmem:[%s1834_s1 + $0x80] sm:$0xff]  ;;  %v223_v26 = vld [vmem:[%s1834_s1 + $0x58] sm:$0xff]  ;;  %1080 = vmatprep.subr.bf16.mxu1 %v1458_v19 }
  0x19   : > { %1050 = vmatpush1.bf16.msra.mxu0 %v1432_v10  ;;  %v233_v22 = vld [vmem:[%s1834_s1 + $0xa8] sm:$0xff]  ;;  %v232_v25 = vld [vmem:[%s1834_s1 + $0xa0] sm:$0xff]  ;;  %v227_v27 = vld [vmem:[%s1834_s1 + $0x78] sm:$0xff] }
  0x1a   : > { %1052 = vmatprep.subr.bf16.mxu0 %v1434_v11  ;;  %v1472_v24 = vpack.c.bf16 %v233_v22, %v229_v21  ;;  %v1484_v28 = vpack.c.bf16 %v227_v27, %v223_v26  ;;  %v222_v29 = vld [vmem:[%s1834_s1 + $0x50] sm:$0xff]  ;;  %v237_v31 = vld [vmem:[%s1834_s1 + $0xc8] sm:$0xff]  ;;  %1082 = vmatpush1.bf16.msra.mxu1 %v1460_v20  ;;  %v1502_v34 = vpack.c.bf16 %v232_v25, %v228_v23  ;;  %v231_v35 = vld [vmem:[%s1834_s1 + $0x98] sm:$0xff] }
  0x1b   : > { %v226_v30 = vld [vmem:[%s1834_s1 + $0x70] sm:$0xff]  ;;  %v241_v33 = vld [vmem:[%s1834_s1 + $0xe8] sm:$0xff]  ;;  %v235_v36 = vld [vmem:[%s1834_s1 + $0xb8] sm:$0xff] }
  0x1c   : > { %v1496_v32 = vpack.c.bf16 %v226_v30, %v222_v29  ;;  %1084 = vmatprep.subr.bf16.mxu1 %v1484_v28  ;;  %v230_v37 = vld [vmem:[%s1834_s1 + $0x90] sm:$0xff]  ;;  %v1515_v38 = vpack.c.bf16 %v241_v33, %v237_v31  ;;  %v236_v39 = vld [vmem:[%s1834_s1 + $0xc0] sm:$0xff]  ;;  %v1523_v41 = vpack.c.bf16 %v235_v36, %v231_v35  ;;  %v245_v43 = vld [vmem:[%s1834_s1 + $0x108] sm:$0xff] }
  0x1d   : > { %1054 = vmatpush1.bf16.msra.mxu0 %v1456_v18  ;;  %v240_v40 = vld [vmem:[%s1834_s1 + $0xe0] sm:$0xff]  ;;  %v234_v42 = vld [vmem:[%s1834_s1 + $0xb0] sm:$0xff]  ;;  %v249_v44 = vld [vmem:[%s1834_s1 + $0x128] sm:$0xff] }
  0x1e   : > { %1056 = vmatprep.subr.bf16.mxu0 %v1472_v24  ;;  %v239_v45 = vld [vmem:[%s1834_s1 + $0xd8] sm:$0xff]  ;;  %1086 = vmatpush1.bf16.msra.mxu1 %v1496_v32  ;;  %v1538_v46 = vpack.c.bf16 %v234_v42, %v230_v37  ;;  %v1544_v48 = vpack.c.bf16 %v240_v40, %v236_v39  ;;  %v244_v49 = vld [vmem:[%s1834_s1 + $0x100] sm:$0xff]  ;;  %v238_v51 = vld [vmem:[%s1834_s1 + $0xd0] sm:$0xff]  ;;  %v1559_v53 = vpack.c.bf16 %v249_v44, %v245_v43 }
  0x1f   : > { %v243_v47 = vld [vmem:[%s1834_s1 + $0xf8] sm:$0xff]  ;;  %1088 = vmatprep.subr.bf16.mxu1 %v1523_v41  ;;  %v242_v52 = vld [vmem:[%s1834_s1 + $0xf0] sm:$0xff]  ;;  %v248_v54 = vld [vmem:[%s1834_s1 + $0x120] sm:$0xff] }
  0x20   : > { %v1550_v50 = vpack.c.bf16 %v243_v47, %v239_v45  ;;  %v247_v55 = vld [vmem:[%s1834_s1 + $0x118] sm:$0xff]  ;;  %v253_v57 = vld [vmem:[%s1834_s1 + $0x148] sm:$0xff]  ;;  %v1577_v59 = vpack.c.bf16 %v242_v52, %v238_v51  ;;  %v1580_v60 = vpack.c.bf16 %v248_v54, %v244_v49  ;;  %v252_v61 = vld [vmem:[%s1834_s1 + $0x140] sm:$0xff] }
  0x21   : > { %1058 = vmatpush1.bf16.msra.mxu0 %v1502_v34  ;;  %v251_v56 = vld [vmem:[%s1834_s1 + $0x138] sm:$0xff]  ;;  %v257_v58 = vld [vmem:[%s1834_s1 + $0x168] sm:$0xff]  ;;  %v246_v63 = vld [vmem:[%s1834_s1 + $0x110] sm:$0xff] }
  0x22   : > { %1060 = vmatprep.subr.bf16.mxu0 %v1515_v38  ;;  %1090 = vmatpush1.bf16.msra.mxu1 %v1538_v46  ;;  %v1586_v62 = vpack.c.bf16 %v251_v56, %v247_v55  ;;  %v250_v0 = vld [vmem:[%s1834_s1 + $0x130] sm:$0xff]  ;;  %v1595_v1 = vpack.c.bf16 %v257_v58, %v253_v57  ;;  %v256_v2 = vld [vmem:[%s1834_s1 + $0x160] sm:$0xff]  ;;  %v255_v3 = vld [vmem:[%s1834_s1 + $0x158] sm:$0xff] }
  0x23   : > { %1092 = vmatprep.subr.bf16.mxu1 %v1550_v50  ;;  %v259_v4 = vld [vmem:[%s1834_s1 + $0x178] sm:$0xff]  ;;  %v261_v6 = vld [vmem:[%s1834_s1 + $0x188] sm:$0xff]  ;;  %v1613_v8 = vpack.c.bf16 %v250_v0, %v246_v63  ;;  %v1616_v12 = vpack.c.bf16 %v256_v2, %v252_v61  ;;  %v260_v13 = vld [vmem:[%s1834_s1 + $0x180] sm:$0xff] }
  0x24   : > { %v265_v7 = vld [vmem:[%s1834_s1 + $0x1a8] sm:$0xff]  ;;  %v1622_v14 = vpack.c.bf16 %v259_v4, %v255_v3  ;;  %v254_v15 = vld [vmem:[%s1834_s1 + $0x150] sm:$0xff]  ;;  %v264_v21 = vld [vmem:[%s1834_s1 + $0x1a0] sm:$0xff] }
  0x25   : > { %1062 = vmatpush1.bf16.msra.mxu0 %v1544_v48  ;;  %v258_v16 = vld [vmem:[%s1834_s1 + $0x170] sm:$0xff]  ;;  %v1631_v17 = vpack.c.bf16 %v265_v7, %v261_v6  ;;  %v263_v22 = vld [vmem:[%s1834_s1 + $0x198] sm:$0xff]  ;;  %v269_v25 = vld [vmem:[%s1834_s1 + $0x1c8] sm:$0xff]  ;;  %v1652_v29 = vpack.c.bf16 %v264_v21, %v260_v13 }
  0x26   : > { %1064 = vmatprep.subr.bf16.mxu0 %v1559_v53  ;;  %1094 = vmatpush1.bf16.msra.mxu1 %v1577_v59  ;;  %v267_v23 = vld [vmem:[%s1834_s1 + $0x1b8] sm:$0xff]  ;;  %v273_v26 = vld [vmem:[%s1834_s1 + $0x1e8] sm:$0xff]  ;;  %v1649_v27 = vpack.c.bf16 %v258_v16, %v254_v15  ;;  %v268_v30 = vld [vmem:[%s1834_s1 + $0x1c0] sm:$0xff] }
  0x27   : > { %1096 = vmatprep.subr.bf16.mxu1 %v1586_v62  ;;  %v1658_v31 = vpack.c.bf16 %v267_v23, %v263_v22  ;;  %v262_v33 = vld [vmem:[%s1834_s1 + $0x190] sm:$0xff]  ;;  %v1667_v36 = vpack.c.bf16 %v273_v26, %v269_v25  ;;  %v272_v37 = vld [vmem:[%s1834_s1 + $0x1e0] sm:$0xff]  ;;  %v271_v39 = vld [vmem:[%s1834_s1 + $0x1d8] sm:$0xff] }
  0x28   : > { %v266_v35 = vld [vmem:[%s1834_s1 + $0x1b0] sm:$0xff]  ;;  %v275_v40 = vld [vmem:[%s1834_s1 + $0x1f8] sm:$0xff]  ;;  %v1682_v43 = vpack.c.bf16 %v272_v37, %v268_v30  ;;  %v276_v51 = vld [vmem:[#allocation2] sm:$0xff] }
  0x29   : > { %1066 = vmatpush1.bf16.msra.mxu0 %v1580_v60  ;;  %v1679_v42 = vpack.c.bf16 %v266_v35, %v262_v33  ;;  %v1685_v44 = vpack.c.bf16 %v275_v40, %v271_v39  ;;  %v270_v45 = vld [vmem:[%s1834_s1 + $0x1d0] sm:$0xff]  ;;  %v278_v52 = vld [vmem:[%s1397_s22] sm:$0xff]  ;;  %v279_v54 = vld [vmem:[%s1397_s22 + $0x8] sm:$0xff] }
  0x2a   : > { %1068 = vmatprep.subr.bf16.mxu0 %v1595_v1  ;;  %1098 = vmatpush1.bf16.msra.mxu1 %v1613_v8  ;;  %v274_v47 = vld [vmem:[%s1834_s1 + $0x1f0] sm:$0xff]  ;;  %v281_v6 = vld [vmem:[%s1397_s22 + $0x18] sm:$0xff]  ;;  %v277_v26 = vld [vmem:[#allocation3] sm:$0xff] }
  0x2b   : > { %1100 = vmatprep.subr.bf16.mxu1 %v1622_v14  ;;  %v1695_v49 = vpack.c.bf16 %v274_v47, %v270_v45  ;;  %v280_v58 = vld [vmem:[%s1397_s22 + $0x10] sm:$0xff] }
  0x2d   : > { %1070 = vmatpush1.bf16.msra.mxu0 %v1616_v12 }
  0x2e   : > { %1072 = vmatprep.subr.bf16.mxu0 %v1631_v17  ;;  %1102 = vmatpush1.bf16.msra.mxu1 %v1649_v27 }
  0x2f   : > { %1104 = vmatprep.subr.bf16.mxu1 %v1658_v31 }
  0x31   : > { %1074 = vmatpush1.bf16.msra.mxu0 %v1652_v29 }
  0x32   : > { %1076 = vmatprep.subr.bf16.mxu0 %v1667_v36  ;;  %1106 = vmatpush1.bf16.msra.mxu1 %v1679_v42 }
  0x33   : > { %1108 = vmatprep.subr.bf16.mxu1 %v1685_v44 }
  0x35   : > { %1078 = vmatpush1.bf16.msra.mxu0 %v1682_v43 }
  0x36   : > { %1112 = vmatprep.subr.bf16.mxu0 %v1419_v5  ;;  %1110 = vmatpush1.bf16.msra.mxu1 %v1695_v49 }
  0x37   : > { %1144 = vmatprep.subr.bf16.mxu1 %v1458_v19 }
  0x38   : > { %347 = vmatmul.mubr.f32.vlgmr.msra.gmra.mrb[0].mxu0 %v276_v51 }
  0x39   : > { %1114 = vmatpush1.bf16.msra.mxu0 %v1432_v10  ;;  %516 = vmatprep.mubr.f32.mxu0 %v1360_v9 }
  0x3a   : > { %1116 = vmatprep.subr.bf16.mxu0 %v1434_v11  ;;  %418 = vmatmul.mubr.f32.vlgmr.msra.gmra.mrb[0].mxu1 %v276_v51 }
  0x3b   : > { %1146 = vmatpush1.bf16.msra.mxu1 %v1460_v20  ;;  %587 = vmatprep.mubr.f32.mxu1 %v1360_v9 }
  0x3c   : > { %1148 = vmatprep.subr.bf16.mxu1 %v1484_v28 }
  0x3d   : > { %1118 = vmatpush1.bf16.msra.mxu0 %v1456_v18 }
  0x3e   : > { %1120 = vmatprep.subr.bf16.mxu0 %v1472_v24 }
  0x3f   : > { %1150 = vmatpush1.bf16.msra.mxu1 %v1496_v32 }
  0x40   : > { %1152 = vmatprep.subr.bf16.mxu1 %v1523_v41 }
  0x41   : > { %1122 = vmatpush1.bf16.msra.mxu0 %v1502_v34 }
  0x42   : > { %1124 = vmatprep.subr.bf16.mxu0 %v1515_v38 }
  0x43   : > { %1154 = vmatpush1.bf16.msra.mxu1 %v1538_v46 }
  0x44   : > { %1156 = vmatprep.subr.bf16.mxu1 %v1550_v50 }
  0x45   : > { %1126 = vmatpush1.bf16.msra.mxu0 %v1544_v48 }
  0x46   : > { %1128 = vmatprep.subr.bf16.mxu0 %v1559_v53 }
  0x47   : > { %1158 = vmatpush1.bf16.msra.mxu1 %v1577_v59 }
  0x48   : > { %1160 = vmatprep.subr.bf16.mxu1 %v1586_v62 }
  0x49   : > { %1130 = vmatpush1.bf16.msra.mxu0 %v1580_v60 }
  0x4a   : > { %1132 = vmatprep.subr.bf16.mxu0 %v1595_v1 }
  0x4b   : > { %1162 = vmatpush1.bf16.msra.mxu1 %v1613_v8 }
  0x4c   : > { %1164 = vmatprep.subr.bf16.mxu1 %v1622_v14 }
  0x4d   : > { %1134 = vmatpush1.bf16.msra.mxu0 %v1616_v12 }
  0x4e   : > { %1136 = vmatprep.subr.bf16.mxu0 %v1631_v17 }
  0x4f   : > { %1166 = vmatpush1.bf16.msra.mxu1 %v1649_v27 }
  0x50   : > { %1168 = vmatprep.subr.bf16.mxu1 %v1658_v31 }
  0x51   : > { %1138 = vmatpush1.bf16.msra.mxu0 %v1652_v29 }
  0x52   : > { %1140 = vmatprep.subr.bf16.mxu0 %v1667_v36 }
  0x53   : > { %1170 = vmatpush1.bf16.msra.mxu1 %v1679_v42 }
  0x54   : > { %1172 = vmatprep.subr.bf16.mxu1 %v1685_v44 }
  0x55   : > { %1142 = vmatpush1.bf16.msra.mxu0 %v1682_v43 }
  0x56   : > { %1176 = vmatprep.subr.bf16.mxu0 %v1419_v5 }
  0x57   : > { %1174 = vmatpush1.bf16.msra.mxu1 %v1695_v49 }
  0x58   : > { %1208 = vmatprep.subr.bf16.mxu1 %v1458_v19 }
 0x10b   : > { %v348_v55 = vpop.f32.mrb[0].mxu0 }
 0x10c   : > { %v424_v56 = vadd.f32 %v348_v55, %v278_v52  ;;  %v350_v57 = vpop.f32.mrb[1].mxu0  ;;  %v1029_v52 = vld [vmem:[%s1397_s22 + $0x20] sm:$0xff] }
 0x10d   : > { %v425_v61 = vadd.f32 %v350_v57, %v279_v54  ;;  %v419_v0 = vpop.f32.mrb[0].mxu1  ;;  %v1030_v54 = vld [vmem:[%s1397_s22 + $0x28] sm:$0xff] }
 0x10e   : > { %v428_v63 = vmul.f32 0.5, %v424_v56  ;;  %v426_v3 = vadd.f32 %v419_v0, %v280_v58  ;;  %v421_v4 = vpop.f32.mrb[1].mxu1 }
 0x10f   : > { %v432_v2 = vmul.f32 0.5, %v425_v61  ;;  %v427_v7 = vadd.f32 %v421_v4, %v281_v6  ;;  %v1032_v6 = vld [vmem:[%s1397_s22 + $0x38] sm:$0xff] }
 0x110   : > { %1312 = vtanh.f32 %v428_v63  ;;  %v1031_v63 = vld [vmem:[%s1397_s22 + $0x30] sm:$0xff] }
 0x111   : > { %1314 = vtanh.f32 %v432_v2  ;;  %v437_v13 = vmul.f32 0.5, %v427_v7 }
 0x112   : > { %1316 = vtanh.f32 %v426_v3 }
 0x113   : > { %1318 = vtanh.f32 %v437_v13 }
 0x11a   : > { %v1313_v15 = vpop.eup %1312 }
 0x11b   : > { %v1315_v16 = vpop.eup %1314  ;;  %v430_v21 = vmul.f32 0.5, %v1313_v15 }
 0x11c   : > { %v1317_v22 = vpop.eup %1316  ;;  %v434_v23 = vmul.f32 0.5, %v1315_v16 }
 0x11d   : > { %v431_v25 = vadd.f32 0.5, %v430_v21  ;;  %v1319_v39 = vpop.eup %1318 }
 0x11e   : > { %v435_v30 = vadd.f32 0.5, %v434_v23  ;;  %v439_v40 = vmul.f32 0.5, %v1319_v39 }
 0x11f   : > { %v442_v33 = vmul.f32 %v1317_v22, %v431_v25 }
 0x120   : > { %v441_v35 = vmul.f32 %v435_v30, %v277_v26  ;;  %v440_v45 = vadd.f32 0.5, %v439_v40 }
 0x122   : > { %v1740_v37 = vadd.f32 %v442_v33, %v441_v35 }
 0x124   : > { %1320 = vtanh.f32 %v1740_v37 }
 0x12e   : > { %v1321_v47 = vpop.eup %1320 }
 0x12f   : > { %v445_v51 = vmul.f32 %v1321_v47, %v440_v45 }
 0x131   : > { %446 = vst [vmem:[%s1402_s25] sm:$0xff] %v445_v51  ;;  %517 = vmatmul.mubr.f32.vlgmr.msra.gmra.mrb[2].mxu0 %v445_v51  ;;  %588 = vmatmul.mubr.f32.vlgmr.msra.gmra.mrb[2].mxu1 %v445_v51 }
 0x132   : > { %1178 = vmatpush1.bf16.msra.mxu0 %v1432_v10  ;;  %1210 = vmatpush1.bf16.msra.mxu1 %v1460_v20 }
 0x133   : > { %1180 = vmatprep.subr.bf16.mxu0 %v1434_v11  ;;  %1212 = vmatprep.subr.bf16.mxu1 %v1484_v28 }
 0x134   : > { %687 = vmatprep.mubr.f32.mxu0 %v1360_v9  ;;  %758 = vmatprep.mubr.f32.mxu1 %v1360_v9 }
 0x136   : > { %1182 = vmatpush1.bf16.msra.mxu0 %v1456_v18  ;;  %1214 = vmatpush1.bf16.msra.mxu1 %v1496_v32 }
 0x137   : > { %1184 = vmatprep.subr.bf16.mxu0 %v1472_v24  ;;  %1216 = vmatprep.subr.bf16.mxu1 %v1523_v41 }
 0x13a   : > { %1186 = vmatpush1.bf16.msra.mxu0 %v1502_v34  ;;  %1218 = vmatpush1.bf16.msra.mxu1 %v1538_v46 }
 0x13b   : > { %1188 = vmatprep.subr.bf16.mxu0 %v1515_v38  ;;  %1220 = vmatprep.subr.bf16.mxu1 %v1550_v50 }
 0x13e   : > { %1190 = vmatpush1.bf16.msra.mxu0 %v1544_v48  ;;  %1222 = vmatpush1.bf16.msra.mxu1 %v1577_v59 }
 0x13f   : > { %1192 = vmatprep.subr.bf16.mxu0 %v1559_v53  ;;  %1224 = vmatprep.subr.bf16.mxu1 %v1586_v62 }
 0x142   : > { %1194 = vmatpush1.bf16.msra.mxu0 %v1580_v60  ;;  %1226 = vmatpush1.bf16.msra.mxu1 %v1613_v8 }
 0x143   : > { %1196 = vmatprep.subr.bf16.mxu0 %v1595_v1  ;;  %1228 = vmatprep.subr.bf16.mxu1 %v1622_v14 }
 0x146   : > { %1198 = vmatpush1.bf16.msra.mxu0 %v1616_v12  ;;  %1230 = vmatpush1.bf16.msra.mxu1 %v1649_v27 }
 0x147   : > { %1200 = vmatprep.subr.bf16.mxu0 %v1631_v17  ;;  %1232 = vmatprep.subr.bf16.mxu1 %v1658_v31 }
 0x14a   : > { %1202 = vmatpush1.bf16.msra.mxu0 %v1652_v29  ;;  %1234 = vmatpush1.bf16.msra.mxu1 %v1679_v42 }
 0x14b   : > { %1204 = vmatprep.subr.bf16.mxu0 %v1667_v36  ;;  %1236 = vmatprep.subr.bf16.mxu1 %v1685_v44 }
 0x14e   : > { %1206 = vmatpush1.bf16.msra.mxu0 %v1682_v43  ;;  %1238 = vmatpush1.bf16.msra.mxu1 %v1695_v49 }
 0x14f   : > { %1240 = vmatprep.subr.bf16.mxu0 %v1419_v5  ;;  %1272 = vmatprep.subr.bf16.mxu1 %v1458_v19 }
 0x204   : > { %v518_v55 = vpop.f32.mrb[2].mxu0  ;;  %v589_v56 = vpop.f32.mrb[2].mxu1 }
 0x205   : > { %v594_v57 = vadd.f32 %v1029_v52, %v518_v55  ;;  %v520_v58 = vpop.f32.mrb[3].mxu0  ;;  %v591_v61 = vpop.f32.mrb[3].mxu1  ;;  %v596_v4 = vadd.f32 %v1031_v63, %v589_v56  ;;  %v1041_v56 = vld [vmem:[%s1397_s22 + $0x70] sm:$0xff] }
 0x206   : > { %v595_v0 = vadd.f32 %v1030_v54, %v520_v58  ;;  %v597_v5 = vadd.f32 %v1032_v6, %v591_v61 }
 0x207   : > { %v598_v2 = vmul.f32 0.5, %v594_v57 }
 0x208   : > { %v602_v3 = vmul.f32 0.5, %v595_v0  ;;  %v607_v7 = vmul.f32 0.5, %v597_v5  ;;  %v1042_v0 = vld [vmem:[%s1397_s22 + $0x78] sm:$0xff] }
 0x209   : > { %1322 = vtanh.f32 %v598_v2 }
 0x20a   : > { %1324 = vtanh.f32 %v602_v3 }
 0x20b   : > { %1326 = vtanh.f32 %v596_v4 }
 0x20c   : > { %1328 = vtanh.f32 %v607_v7 }
 0x213   : > { %v1323_v13 = vpop.eup %1322 }
 0x214   : > { %v1325_v19 = vpop.eup %1324  ;;  %v600_v15 = vmul.f32 0.5, %v1323_v13 }
 0x215   : > { %v604_v16 = vmul.f32 0.5, %v1325_v19  ;;  %v1327_v22 = vpop.eup %1326 }
 0x216   : > { %v601_v21 = vadd.f32 0.5, %v600_v15  ;;  %v1329_v33 = vpop.eup %1328 }
 0x217   : > { %v605_v23 = vadd.f32 0.5, %v604_v16  ;;  %v609_v35 = vmul.f32 0.5, %v1329_v33 }
 0x218   : > { %v612_v25 = vmul.f32 %v1327_v22, %v601_v21 }
 0x219   : > { %v611_v26 = vmul.f32 %v605_v23, %v1740_v37  ;;  %v610_v39 = vadd.f32 0.5, %v609_v35  ;;  %v1040_v37 = vld [vmem:[%s1397_s22 + $0x68] sm:$0xff] }
 0x21b   : > { %v1783_v30 = vadd.f32 %v612_v25, %v611_v26 }
 0x21d   : > { %1330 = vtanh.f32 %v1783_v30 }
 0x227   : > { %v1331_v40 = vpop.eup %1330 }
 0x228   : > { %v615_v45 = vmul.f32 %v1331_v40, %v610_v39 }
 0x22a   : > { %1033 = vst [vmem:[%s1402_s25 + $0x8] sm:$0xff] %v615_v45  ;;  %688 = vmatmul.mubr.f32.vlgmr.msra.gmra.mrb[4].mxu0 %v615_v45  ;;  %759 = vmatmul.mubr.f32.vlgmr.msra.gmra.mrb[4].mxu1 %v615_v45 }
 0x22b   : > { %1242 = vmatpush1.bf16.msra.mxu0 %v1432_v10  ;;  %1274 = vmatpush1.bf16.msra.mxu1 %v1460_v20  ;;  %v1035_v10 = vld [vmem:[%s1397_s22 + $0x48] sm:$0xff] }
 0x22c   : > { %1244 = vmatprep.subr.bf16.mxu0 %v1434_v11  ;;  %1276 = vmatprep.subr.bf16.mxu1 %v1484_v28 }
 0x22d   : > { %858 = vmatprep.mubr.f32.mxu0 %v1360_v9  ;;  %929 = vmatprep.mubr.f32.mxu1 %v1360_v9  ;;  %v1034_v9 = vld [vmem:[%s1397_s22 + $0x40] sm:$0xff] }
 0x22f   : > { %1246 = vmatpush1.bf16.msra.mxu0 %v1456_v18  ;;  %1278 = vmatpush1.bf16.msra.mxu1 %v1496_v32  ;;  %v1036_v32 = vld [vmem:[%s1397_s22 + $0x50] sm:$0xff] }
 0x230   : > { %1248 = vmatprep.subr.bf16.mxu0 %v1472_v24  ;;  %1280 = vmatprep.subr.bf16.mxu1 %v1523_v41 }
 0x233   : > { %1250 = vmatpush1.bf16.msra.mxu0 %v1502_v34  ;;  %1282 = vmatpush1.bf16.msra.mxu1 %v1538_v46 }
 0x234   : > { %1252 = vmatprep.subr.bf16.mxu0 %v1515_v38  ;;  %1284 = vmatprep.subr.bf16.mxu1 %v1550_v50 }
 0x237   : > { %1254 = vmatpush1.bf16.msra.mxu0 %v1544_v48  ;;  %1286 = vmatpush1.bf16.msra.mxu1 %v1577_v59  ;;  %v1037_v48 = vld [vmem:[%s1397_s22 + $0x58] sm:$0xff] }
 0x238   : > { %1256 = vmatprep.subr.bf16.mxu0 %v1559_v53  ;;  %1288 = vmatprep.subr.bf16.mxu1 %v1586_v62 }
 0x23b   : > { %1258 = vmatpush1.bf16.msra.mxu0 %v1580_v60  ;;  %1290 = vmatpush1.bf16.msra.mxu1 %v1613_v8 }
 0x23c   : > { %1260 = vmatprep.subr.bf16.mxu0 %v1595_v1  ;;  %1292 = vmatprep.subr.bf16.mxu1 %v1622_v14 }
 0x23f   : > { %1262 = vmatpush1.bf16.msra.mxu0 %v1616_v12  ;;  %1294 = vmatpush1.bf16.msra.mxu1 %v1649_v27 }
 0x240   : > { %1264 = vmatprep.subr.bf16.mxu0 %v1631_v17  ;;  %1296 = vmatprep.subr.bf16.mxu1 %v1658_v31 }
 0x243   : > { %1266 = vmatpush1.bf16.msra.mxu0 %v1652_v29  ;;  %1298 = vmatpush1.bf16.msra.mxu1 %v1679_v42 }
 0x244   : > { %1268 = vmatprep.subr.bf16.mxu0 %v1667_v36  ;;  %1300 = vmatprep.subr.bf16.mxu1 %v1685_v44 }
 0x247   : > { %1270 = vmatpush1.bf16.msra.mxu0 %v1682_v43  ;;  %1302 = vmatpush1.bf16.msra.mxu1 %v1695_v49  ;;  %v1039_v49 = vld [vmem:[%s1397_s22 + $0x60] sm:$0xff] }
 0x2fd   : > { %v689_v11 = vpop.f32.mrb[4].mxu0  ;;  %v760_v18 = vpop.f32.mrb[4].mxu1 }
 0x2fe   : > { %v765_v20 = vadd.f32 %v1034_v9, %v689_v11  ;;  %v691_v24 = vpop.f32.mrb[5].mxu0  ;;  %v762_v28 = vpop.f32.mrb[5].mxu1  ;;  %v767_v46 = vadd.f32 %v1036_v32, %v760_v18 }
 0x2ff   : > { %v766_v34 = vadd.f32 %v1035_v10, %v691_v24  ;;  %v768_v50 = vadd.f32 %v1037_v48, %v762_v28 }
 0x300   : > { %v769_v38 = vmul.f32 0.5, %v765_v20 }
 0x301   : > { %v773_v41 = vmul.f32 0.5, %v766_v34  ;;  %v778_v53 = vmul.f32 0.5, %v768_v50 }
 0x302   : > { %1332 = vtanh.f32 %v769_v38 }
 0x303   : > { %1334 = vtanh.f32 %v773_v41 }
 0x304   : > { %1336 = vtanh.f32 %v767_v46 }
 0x305   : > { %1338 = vtanh.f32 %v778_v53 }
 0x30c   : > { %v1333_v59 = vpop.eup %1332 }
 0x30d   : > { %v1335_v60 = vpop.eup %1334  ;;  %v771_v62 = vmul.f32 0.5, %v1333_v59 }
 0x30e   : > { %v775_v1 = vmul.f32 0.5, %v1335_v60  ;;  %v1337_v12 = vpop.eup %1336 }
 0x30f   : > { %v772_v8 = vadd.f32 0.5, %v771_v62  ;;  %v1339_v31 = vpop.eup %1338 }
 0x310   : > { %v776_v14 = vadd.f32 0.5, %v775_v1  ;;  %v780_v36 = vmul.f32 0.5, %v1339_v31 }
 0x311   : > { %v783_v17 = vmul.f32 %v1337_v12, %v772_v8 }
 0x312   : > { %v782_v27 = vmul.f32 %v776_v14, %v1783_v30  ;;  %v781_v42 = vadd.f32 0.5, %v780_v36 }
 0x314   : > { %v784_v29 = vadd.f32 %v783_v17, %v782_v27 }
 0x316   : > { %1340 = vtanh.f32 %v784_v29 }
 0x320   : > { %v1341_v43 = vpop.eup %1340 }
 0x321   : > { %v786_v44 = vmul.f32 %v1341_v43, %v781_v42 }
 0x323   : > { %1038 = vst [vmem:[%s1402_s25 + $0x10] sm:$0xff] %v786_v44  ;;  %859 = vmatmul.mubr.f32.vlgmr.msra.gmra.mrb[6].mxu0 %v786_v44  ;;  %930 = vmatmul.mubr.f32.vlgmr.msra.gmra.mrb[6].mxu1 %v786_v44 }
 0x3f6   : > { %v860_v47 = vpop.f32.mrb[6].mxu0  ;;  %v931_v51 = vpop.f32.mrb[6].mxu1 }
 0x3f7   : > { %v936_v52 = vadd.f32 %v1039_v49, %v860_v47  ;;  %v862_v54 = vpop.f32.mrb[7].mxu0  ;;  %v933_v55 = vpop.f32.mrb[7].mxu1  ;;  %v938_v63 = vadd.f32 %v1041_v56, %v931_v51 }
 0x3f8   : > { %v937_v57 = vadd.f32 %v1040_v37, %v862_v54  ;;  %v939_v2 = vadd.f32 %v1042_v0, %v933_v55 }
 0x3f9   : > { %v940_v58 = vmul.f32 0.5, %v936_v52 }
 0x3fa   : > { %v944_v61 = vmul.f32 0.5, %v937_v57  ;;  %v949_v3 = vmul.f32 0.5, %v939_v2 }
 0x3fb   : > { %1342 = vtanh.f32 %v940_v58 }
 0x3fc   : > { %1344 = vtanh.f32 %v944_v61 }
 0x3fd   : > { %1346 = vtanh.f32 %v938_v63 }
 0x3fe   : > { %1348 = vtanh.f32 %v949_v3 }
 0x405   : > { %v1343_v4 = vpop.eup %1342 }
 0x406   : > { %v1345_v6 = vpop.eup %1344  ;;  %v942_v5 = vmul.f32 0.5, %v1343_v4 }
 0x407   : > { %v946_v7 = vmul.f32 0.5, %v1345_v6  ;;  %v1347_v19 = vpop.eup %1346 }
 0x408   : > { %v943_v13 = vadd.f32 0.5, %v942_v5  ;;  %v1349_v23 = vpop.eup %1348 }
 0x409   : > { %v947_v15 = vadd.f32 0.5, %v946_v7  ;;  %v951_v25 = vmul.f32 0.5, %v1349_v23 }
 0x40a   : > { %v954_v16 = vmul.f32 %v1347_v19, %v943_v13 }
 0x40b   : > { %v953_v21 = vmul.f32 %v947_v15, %v784_v29  ;;  %v952_v26 = vadd.f32 0.5, %v951_v25 }
 0x40d   : > { %v955_v22 = vadd.f32 %v954_v16, %v953_v21 }
 0x40f   : > { %1350 = vtanh.f32 %v955_v22  ;;  %961 = vst [vmem:[#allocation3] sm:$0xff] %v955_v22 }
 0x419   : > { %v1351_v30 = vpop.eup %1350 }
 0x41a   : > { %v957_v33 = vmul.f32 %v1351_v30, %v952_v26 }
 0x41c   : > { %1043 = vst [vmem:[%s1402_s25 + $0x18] sm:$0xff] %v957_v33  ;;  %960 = vst [vmem:[#allocation2] sm:$0xff] %v957_v33 }
 0x41d PF: > { %s14_s15 = sadd.s32 1, %s1358_s15  }
 0x41e   : > { %p11_p5 = scmp.ge.s32.totalorder %s14_s15, 4  }
 0x420   :  { %13 = sbr.rel (!%p11_p5) target bundleno = 1 (0x1), region = 76 }

</bundles_post_ra>
